<compile_context>
chip_gen: v7x
topology: tpu7x:2x2x1
jax: 0.10.0
libtpu: 0.0.40
codegen_flags: <defaults>
</compile_context>

<pallas_src>
import functools
import math

import jax
import jax.numpy as jnp
from jax import lax
from jax.experimental import pallas as pl
from jax.experimental.pallas import tpu as pltpu

LN_EPS = 1e-5          # torch.nn.LayerNorm default
LB_WEIGHT = 0.01       # lb_weight in the reference (only used when labels given)
_NEG = -1e30
_VMEM_LIMIT = 48 * 1024 * 1024


def _layernorm(h, gamma, beta):
    mu = jnp.mean(h, axis=-1, keepdims=True)
    var = jnp.mean(jnp.square(h - mu), axis=-1, keepdims=True)
    return (h - mu) * lax.rsqrt(var + LN_EPS) * gamma + beta


# ----------------------------------------------------------------------------
# Fused transformer block kernel.
# grid = (B, n_experts): attention + ln1 + router/gating run once per batch
# element (ex == 0); each grid step streams ONE expert's weights from HBM and
# accumulates its gated output into VMEM scratch; ln2 + store at the last expert.
# ----------------------------------------------------------------------------
def _block_kernel(x_ref,
                  wqkv_ref, bqkv_ref, wo_ref, bo_ref,
                  ln1g_ref, ln1b_ref,
                  rw_ref, rb_ref,
                  w1_ref, b1_ref, w2_ref, b2_ref,
                  ln2g_ref, ln2b_ref,
                  y_ref, f_ref, p_ref,
                  x1_sc, x1b_sc, gate_sc, acc_sc,
                  *, n_heads, n_experts, top_k, stat_pad):
    ex = pl.program_id(1)

    # ---- once per batch element: causal MHA -> ln1 -> router/top-k gating ----
    @pl.when(ex == 0)
    def _attention_and_routing():
        xb = x_ref[0]                                    # (T, E) bf16
        T, E = xb.shape
        Dh = E // n_heads
        scale = 1.0 / math.sqrt(Dh)

        # fused QKV: one lane-dense (T, E) @ (E, 3E) bf16 matmul, f32 accumulate
        qkv = jnp.dot(xb, wqkv_ref[...],
                      preferred_element_type=jnp.float32) + bqkv_ref[...]
        qkv_b = qkv.astype(jnp.bfloat16)
        qh = jnp.stack([qkv_b[:, h * Dh:(h + 1) * Dh]
                        for h in range(n_heads)], 0)            # (H, T, Dh)
        kh = jnp.stack([qkv_b[:, E + h * Dh:E + (h + 1) * Dh]
                        for h in range(n_heads)], 0)
        vh = jnp.stack([qkv_b[:, 2 * E + h * Dh:2 * E + (h + 1) * Dh]
                        for h in range(n_heads)], 0)

        row = lax.broadcasted_iota(jnp.int32, (T, T), 0)
        col = lax.broadcasted_iota(jnp.int32, (T, T), 1)
        causal = (col <= row)[None]                      # (1, T, T)

        # TODO(synk): for long T switch to an online-softmax (flash) KV-tiled loop
        # instead of materializing the (n_heads, T, T) f32 score tensor.
        s = jnp.einsum('htd,hsd->hts', qh, kh,
                       preferred_element_type=jnp.float32) * scale
        s = jnp.where(causal, s, _NEG)
        s = s - jnp.max(s, axis=-1, keepdims=True)
        p = jnp.exp(s)
        p = p / jnp.sum(p, axis=-1, keepdims=True)
        attn_h = jnp.einsum('hts,hsd->htd', p.astype(jnp.bfloat16), vh,
                            preferred_element_type=jnp.float32)  # (H, T, Dh)
        attn_cat = jnp.concatenate([attn_h[h] for h in range(n_heads)],
                                   axis=-1)              # (T, E)
        attn_out = jnp.dot(attn_cat.astype(jnp.bfloat16), wo_ref[...],
                           preferred_element_type=jnp.float32) + bo_ref[...]

        # ln1(x + mha)
        x1 = _layernorm(xb.astype(jnp.float32) + attn_out,
                        ln1g_ref[...], ln1b_ref[...])
        x1b = x1.astype(jnp.bfloat16)
        x1_sc[...] = x1
        x1b_sc[...] = x1b

        # router + top-k masked-softmax gating (stays in registers / VMEM scratch)
        logits = jnp.dot(x1b, rw_ref[...],
                         preferred_element_type=jnp.float32) + rb_ref[...]  # (T, nE)
        # TODO(synk): iterative k-th-max tie-breaks differently from torch.topk if
        # two router logits are exactly equal (measure-zero for float inputs).
        work = logits
        kth = jnp.max(work, axis=-1, keepdims=True)
        for _ in range(top_k - 1):
            work = jnp.where(work >= kth, _NEG, work)
            kth = jnp.max(work, axis=-1, keepdims=True)
        sel = logits >= kth
        masked = jnp.where(sel, logits, _NEG)
        m = jnp.max(masked, axis=-1, keepdims=True)
        e = jnp.exp(masked - m)
        gate_sc[...] = e / jnp.sum(e, axis=-1, keepdims=True)

        # load-balance statistics (Switch-style partials), lane-dense padded store
        pm = jnp.max(logits, axis=-1, keepdims=True)
        pe = jnp.exp(logits - pm)
        probs = pe / jnp.sum(pe, axis=-1, keepdims=True)
        f_vec = jnp.sum(sel.astype(jnp.float32), axis=0, keepdims=True)      # (1, nE)
        p_vec = jnp.sum(probs, axis=0, keepdims=True)                        # (1, nE)
        if stat_pad > n_experts:
            zpad = jnp.zeros((1, stat_pad - n_experts), jnp.float32)
            f_vec = jnp.concatenate([f_vec, zpad], axis=-1)
            p_vec = jnp.concatenate([p_vec, zpad], axis=-1)
        f_ref[0] = f_vec
        p_ref[0] = p_vec

        acc_sc[...] = jnp.zeros_like(acc_sc)

    # ---- one expert per grid step: Linear(E,4E) -> ReLU -> Linear(4E,E) ----
    # TODO(synk): for large batch*T, use top_k-aware routing (sort-by-expert +
    # PrefetchScalarGridSpec data-dependent index_map) so unselected tokens are
    # skipped instead of gated to zero.
    x1b = x1b_sc[...]
    h = jnp.dot(x1b, w1_ref[0], preferred_element_type=jnp.float32) + b1_ref[0]
    h = jnp.maximum(h, 0.0)
    yex = jnp.dot(h.astype(jnp.bfloat16), w2_ref[0],
                  preferred_element_type=jnp.float32) + b2_ref[0]
    lane = lax.broadcasted_iota(jnp.int32, gate_sc.shape, 1)
    g = jnp.sum(jnp.where(lane == ex, gate_sc[...], 0.0),
                axis=1, keepdims=True)                   # (T, 1) gate for expert `ex`
    acc_sc[...] = acc_sc[...] + g * yex

    # ---- ln2(x1 + moe); residual stream goes back to HBM as bf16 ----
    @pl.when(ex == pl.num_programs(1) - 1)
    def _finalize():
        y_ref[0] = _layernorm(x1_sc[...] + acc_sc[...],
                              ln2g_ref[...], ln2b_ref[...]).astype(jnp.bfloat16)


def transformer_block(x, bp, cfg):
    B, T, E = x.shape
    nH, nE, K = cfg["n_heads"], cfg["n_experts"], cfg["top_k"]
    H = bp["w1"].shape[-1]
    stat_pad = max(128, ((nE + 127) // 128) * 128)

    kern = functools.partial(_block_kernel, n_heads=nH, n_experts=nE,
                             top_k=K, stat_pad=stat_pad)
    inv2 = lambda shape: pl.BlockSpec(shape, lambda b, e: (0, 0))
    exp3 = lambda shape: pl.BlockSpec(shape, lambda b, e: (e, 0, 0))

    out_shape = (jax.ShapeDtypeStruct((B, T, E), jnp.bfloat16),
                 jax.ShapeDtypeStruct((B, 1, stat_pad), jnp.float32),
                 jax.ShapeDtypeStruct((B, 1, stat_pad), jnp.float32))

    return pl.pallas_call(
        kern,
        out_shape=out_shape,
        grid=(B, nE),
        in_specs=[
            pl.BlockSpec((1, T, E), lambda b, e: (b, 0, 0)),   # x (resident across experts)
            inv2((E, 3 * E)), inv2((1, 3 * E)),                # fused Wqkv, bqkv
            inv2((E, E)), inv2((1, E)),                        # wo, bo
            inv2((1, E)), inv2((1, E)),                        # ln1 gamma/beta
            inv2((E, nE)), inv2((1, nE)),                      # router w/b
            exp3((1, E, H)), exp3((1, 1, H)),                  # expert w1/b1 (streamed)
            exp3((1, H, E)), exp3((1, 1, E)),                  # expert w2/b2 (streamed)
            inv2((1, E)), inv2((1, E)),                        # ln2 gamma/beta
        ],
        out_specs=(
            pl.BlockSpec((1, T, E), lambda b, e: (b, 0, 0)),
            pl.BlockSpec((1, 1, stat_pad), lambda b, e: (b, 0, 0)),
            pl.BlockSpec((1, 1, stat_pad), lambda b, e: (b, 0, 0)),
        ),
        scratch_shapes=[
            pltpu.VMEM((T, E), jnp.float32),        # x1 (post-ln1, f32 for residual)
            pltpu.VMEM((T, E), jnp.bfloat16),       # x1 bf16 (expert matmul input)
            pltpu.VMEM((T, nE), jnp.float32),       # top-k gates
            pltpu.VMEM((T, E), jnp.float32),        # MoE accumulator
        ],
        compiler_params=pltpu.CompilerParams(
            dimension_semantics=("parallel", "arbitrary"),
            vmem_limit_bytes=_VMEM_LIMIT),
    )(x, bp["wqkv"], bp["bqkv"], bp["wo"], bp["bo"],
      bp["ln1g"], bp["ln1b"], bp["rw"], bp["rb"],
      bp["w1"], bp["b1"], bp["w2"], bp["b2"],
      bp["ln2g"], bp["ln2b"])


# ----------------------------------------------------------------------------
# Fused final LayerNorm + LM head.
# grid = (rows, vocab) with vocab as the inner "arbitrary" axis; the LayerNormed
# row tile is computed once (j == 0) and cached in VMEM scratch.
# ----------------------------------------------------------------------------
def _head_kernel(x_ref, g_ref, b_ref, w_ref, lb_ref, o_ref, h_sc):
    @pl.when(pl.program_id(1) == 0)
    def _():
        h = _layernorm(x_ref[...].astype(jnp.float32), g_ref[...], b_ref[...])
        h_sc[...] = h.astype(jnp.bfloat16)
    o_ref[...] = jnp.dot(h_sc[...], w_ref[...],
                         preferred_element_type=jnp.float32) + lb_ref[...]


def _pick_tile(n, pref, align):
    t = min(pref, n)
    t -= t % align
    while t >= align:
        if n % t == 0:
            return t
        t -= align
    return n            # fall back to full dim (always legal)


def lm_head(x_flat, lnf_g, lnf_b, lm_w_bf16, lm_b, *, tm_pref=512, tn_pref=1024):
    N, E = x_flat.shape
    V = lm_w_bf16.shape[1]
    tm = _pick_tile(N, tm_pref, 8)
    # Cap the vocab tile so double-buffered weight + output tiles keep headroom
    # on v7x's smaller VMEM (budget ~12 MiB for these two).
    tn_cap = tn_pref
    while tn_cap > 128 and (2 * E * tn_cap * 2 + 2 * tm * tn_cap * 4) > 12 * 1024 * 1024:
        tn_cap //= 2
    tn = _pick_tile(V, tn_cap, 128)
    return pl.pallas_call(
        _head_kernel,
        out_shape=jax.ShapeDtypeStruct((N, V), jnp.float32),
        grid=(N // tm, V // tn),
        in_specs=[
            pl.BlockSpec((tm, E), lambda i, j: (i, 0)),
            pl.BlockSpec((1, E), lambda i, j: (0, 0)),
            pl.BlockSpec((1, E), lambda i, j: (0, 0)),
            pl.BlockSpec((E, tn), lambda i, j: (0, j)),
            pl.BlockSpec((1, tn), lambda i, j: (0, j)),
        ],
        out_specs=pl.BlockSpec((tm, tn), lambda i, j: (i, j)),
        scratch_shapes=[pltpu.VMEM((tm, E), jnp.bfloat16)],   # cached normalized tile
        compiler_params=pltpu.CompilerParams(
            dimension_semantics=("parallel", "arbitrary"),
            vmem_limit_bytes=_VMEM_LIMIT),
    )(x_flat, lnf_g, lnf_b, lm_w_bf16, lm_b)


# ----------------------------------------------------------------------------
# Parameter prep (one-time: QKV fusion + bf16 weight cast) and forward
# ----------------------------------------------------------------------------
def _prep_block(blk):
    a, moe = blk["attn"], blk["moe"]
    wqkv = jnp.concatenate([a["wq_t"], a["wk_t"], a["wv_t"]], axis=1).astype(jnp.bfloat16)
    bqkv = jnp.concatenate([a["bq"], a["bk"], a["bv"]], axis=1)
    return dict(
        wqkv=wqkv, bqkv=bqkv,
        wo=a["wo_t"].astype(jnp.bfloat16), bo=a["bo"],
        ln1g=blk["ln1_g"], ln1b=blk["ln1_b"],
        ln2g=blk["ln2_g"], ln2b=blk["ln2_b"],
        rw=moe["router_w_t"].astype(jnp.bfloat16),
        rb=moe["router_b"].reshape(1, -1),
        w1=moe["w1_t"].astype(jnp.bfloat16), b1=moe["b1"],
        w2=moe["w2_t"].astype(jnp.bfloat16), b2=moe["b2"],
    )


def prepare_params(params, cfg):
    # TODO(synk): for real configs pad embed_dim (and head dim) to multiples of 128
    # so tiles are lane-dense; the tiny test config (E=32) is left unpadded.
    del cfg
    return dict(
        tok_emb=params["tok_emb"],
        pos_emb=params["pos_emb"],
        lnf_g=params["lnf_g"], lnf_b=params["lnf_b"],
        lm_w=params["lm_w_t"].astype(jnp.bfloat16),
        lm_b=params["lm_b"].reshape(1, -1),
        blocks=[_prep_block(b) for b in params["blocks"]],
    )


def moe_decoder_forward(prep, input_ids, cfg):
    B, T = input_ids.shape
    E, nE = cfg["embed_dim"], cfg["n_experts"]
    N = B * T

    # TODO(synk): embedding gather + positional add left to XLA (tiny; no clean Pallas win).
    x = (prep["tok_emb"][input_ids] + prep["pos_emb"][:T]).astype(jnp.bfloat16)

    # TODO(synk): exact SparseMoE load-balance loss formula not given in the reference;
    # Switch-transformer style aux loss is accumulated (unused when labels=None).
    total_lb = jnp.float32(0.0)
    for bp in prep["blocks"]:
        x, f_part, p_part = transformer_block(x, bp, cfg)
        f = jnp.sum(f_part, axis=(0, 1))[:nE] / N
        P = jnp.sum(p_part, axis=(0, 1))[:nE] / N
        total_lb = total_lb + nE * jnp.sum(f * P)

    logits = lm_head(x.reshape(N, E), prep["lnf_g"], prep["lnf_b"],
                     prep["lm_w"], prep["lm_b"]).reshape(B, T, -1)
    # labels=None -> loss=None in the reference; total_lb returned for completeness.
    return logits, total_lb


def init_params(key, cfg):
    V, E = cfg["vocab_size"], cfg["embed_dim"]
    BS, nE, nL = cfg["block_size"], cfg["n_experts"], cfg["n_layers"]
    H = 4 * E
    keys = iter(jax.random.split(key, 256))

    def w(shape, scale=0.02):
        return (scale * jax.random.normal(next(keys), shape)).astype(jnp.float32)

    params = dict(
        tok_emb=w((V, E)),
        pos_emb=w((BS, E)),
        lnf_g=jnp.ones((1, E), jnp.float32),
        lnf_b=jnp.zeros((1, E), jnp.float32),
        lm_w_t=w((E, V)),
        lm_b=jnp.zeros((V,), jnp.float32),
        blocks=[],
    )
    for _ in range(nL):
        params["blocks"].append(dict(
            attn=dict(
                wq_t=w((E, E)), bq=jnp.zeros((1, E), jnp.float32),
                wk_t=w((E, E)), bk=jnp.zeros((1, E), jnp.float32),
                wv_t=w((E, E)), bv=jnp.zeros((1, E), jnp.float32),
                wo_t=w((E, E)), bo=jnp.zeros((1, E), jnp.float32),
            ),
            ln1_g=jnp.ones((1, E), jnp.float32), ln1_b=jnp.zeros((1, E), jnp.float32),
            ln2_g=jnp.ones((1, E), jnp.float32), ln2_b=jnp.zeros((1, E), jnp.float32),
            moe=dict(
                router_w_t=w((E, nE)), router_b=jnp.zeros((nE,), jnp.float32),
                w1_t=w((nE, E, H)), b1=jnp.zeros((nE, 1, H), jnp.float32),
                w2_t=w((nE, H, E)), b2=jnp.zeros((nE, 1, E), jnp.float32),
            ),
        ))
    return params


if __name__ == "__main__":
    cfg = dict(vocab_size=64, block_size=16, embed_dim=32,
               n_heads=4, n_experts=4, top_k=2, n_layers=2)
    key = jax.random.PRNGKey(0)
    pkey, ikey = jax.random.split(key)
    params = init_params(pkey, cfg)
    prep = prepare_params(params, cfg)          # one-time QKV fusion / bf16 prep

    B, T = 2, 8
    input_ids = jax.random.randint(ikey, (B, T), 0, cfg["vocab_size"])

    fwd = jax.jit(functools.partial(moe_decoder_forward, cfg=cfg))
    logits, total_lb = fwd(prep, input_ids)
    logits = jax.block_until_ready(logits)
    total_lb = jax.block_until_ready(total_lb)

    assert logits.shape == (B, T, cfg["vocab_size"])
    assert jnp.all(jnp.isfinite(logits))
    assert jnp.isfinite(total_lb)
    print("KERNEL_OK")
</pallas_src>

<mosaic_0001>
module attributes {stable_mosaic.version = 11 : i64} {
  func.func @_head_kernel(%arg0: i32, %arg1: i32, %arg2: memref<16x32xbf16, #tpu.memory_space<vmem>>, %arg3: memref<1x32xf32, #tpu.memory_space<vmem>>, %arg4: memref<1x32xf32, #tpu.memory_space<vmem>>, %arg5: memref<32x64xbf16, #tpu.memory_space<vmem>>, %arg6: memref<1x64xf32, #tpu.memory_space<vmem>>, %arg7: memref<16x64xf32, #tpu.memory_space<vmem>>, %arg8: memref<16x32xbf16, #tpu.memory_space<vmem>>) attributes {dimension_semantics = [#tpu.dimension_semantics<parallel>, #tpu.dimension_semantics<arbitrary>], iteration_bounds = array<i64: 1, 1>, scalar_prefetch = 0 : i64, scratch_operands = 1 : i64, tpu.core_type = #tpu.core_type<tc>, window_params = [{transform_indices = @transform_0, window_bounds = array<i64: 16, 32>}, {pipeline_mode = #tpu.pipeline_mode<synchronous>, transform_indices = @transform_1, window_bounds = array<i64: 1, 32>}, {pipeline_mode = #tpu.pipeline_mode<synchronous>, transform_indices = @transform_2, window_bounds = array<i64: 1, 32>}, {transform_indices = @transform_3, window_bounds = array<i64: 32, 64>}, {transform_indices = @transform_4, window_bounds = array<i64: 1, 64>}, {transform_indices = @transform_5, window_bounds = array<i64: 16, 64>}]} {
    %c0_i32 = arith.constant 0 : i32
    %0 = arith.cmpi eq, %arg1, %c0_i32 : i32
    %1 = arith.extui %0 : i1 to i32
    %c0_i32_0 = arith.constant 0 : i32
    %2 = arith.cmpi ne, %1, %c0_i32_0 : i32
    scf.if %2 {
      %c0_8 = arith.constant 0 : index
      %c0_9 = arith.constant 0 : index
      %10 = vector.load %arg2[%c0_8, %c0_9] : memref<16x32xbf16, #tpu.memory_space<vmem>>, vector<16x32xbf16>
      %11 = arith.extf %10 : vector<16x32xbf16> to vector<16x32xf32>
      %c0_10 = arith.constant 0 : index
      %c0_11 = arith.constant 0 : index
      %12 = vector.load %arg3[%c0_10, %c0_11] : memref<1x32xf32, #tpu.memory_space<vmem>>, vector<1x32xf32>
      %c0_12 = arith.constant 0 : index
      %c0_13 = arith.constant 0 : index
      %13 = vector.load %arg4[%c0_12, %c0_13] : memref<1x32xf32, #tpu.memory_space<vmem>>, vector<1x32xf32>
      %cst_14 = arith.constant dense<0.000000e+00> : vector<16xf32>
      %14 = vector.multi_reduction <add>, %11, %cst_14 [1] : vector<16x32xf32> to vector<16xf32>
      %15 = vector.shape_cast %14 : vector<16xf32> to vector<16x1xf32>
      %cst_15 = arith.constant 3.200000e+01 : f32
      %16 = vector.broadcast %cst_15 : f32 to vector<16x1xf32>
      %17 = arith.divf %15, %16 : vector<16x1xf32>
      %18 = vector.broadcast %17 : vector<16x1xf32> to vector<16x32xf32>
      %19 = arith.subf %11, %18 : vector<16x32xf32>
      %20 = arith.mulf %19, %19 : vector<16x32xf32>
      %cst_16 = arith.constant dense<0.000000e+00> : vector<16xf32>
      %21 = vector.multi_reduction <add>, %20, %cst_16 [1] : vector<16x32xf32> to vector<16xf32>
      %22 = vector.shape_cast %21 : vector<16xf32> to vector<16x1xf32>
      %cst_17 = arith.constant 3.200000e+01 : f32
      %23 = vector.broadcast %cst_17 : f32 to vector<16x1xf32>
      %24 = arith.divf %22, %23 : vector<16x1xf32>
      %25 = vector.broadcast %17 : vector<16x1xf32> to vector<16x32xf32>
      %26 = arith.subf %11, %25 : vector<16x32xf32>
      %cst_18 = arith.constant 9.99999974E-6 : f32
      %27 = vector.broadcast %cst_18 : f32 to vector<16x1xf32>
      %28 = arith.addf %24, %27 : vector<16x1xf32>
      %29 = math.rsqrt %28 : vector<16x1xf32>
      %30 = vector.broadcast %29 : vector<16x1xf32> to vector<16x32xf32>
      %31 = arith.mulf %26, %30 : vector<16x32xf32>
      %32 = vector.broadcast %12 : vector<1x32xf32> to vector<16x32xf32>
      %33 = arith.mulf %31, %32 : vector<16x32xf32>
      %34 = vector.broadcast %13 : vector<1x32xf32> to vector<16x32xf32>
      %35 = arith.addf %33, %34 : vector<16x32xf32>
      %36 = arith.truncf %35 : vector<16x32xf32> to vector<16x32xbf16>
      %c0_19 = arith.constant 0 : index
      %c0_20 = arith.constant 0 : index
      %37 = vector.load %arg8[%c0_19, %c0_20] : memref<16x32xbf16, #tpu.memory_space<vmem>>, vector<16x32xbf16>
      tpu.vector_store %arg8[%c0_19, %c0_20], %36 {strides = array<i32>} : memref<16x32xbf16, #tpu.memory_space<vmem>>, vector<16x32xbf16>,
    } else {
    }
    %c0 = arith.constant 0 : index
    %c0_1 = arith.constant 0 : index
    %3 = vector.load %arg8[%c0, %c0_1] : memref<16x32xbf16, #tpu.memory_space<vmem>>, vector<16x32xbf16>
    %c0_2 = arith.constant 0 : index
    %c0_3 = arith.constant 0 : index
    %4 = vector.load %arg5[%c0_2, %c0_3] : memref<32x64xbf16, #tpu.memory_space<vmem>>, vector<32x64xbf16>
    %cst = arith.constant dense<0.000000e+00> : vector<16x64xf32>
    %5 = tpu.matmul %3, %4, %cst {dimension_numbers = #tpu.dot_dimension_numbers<[1], [0], [0], [1], [0, 0, 1, 1], [], []>} : vector<16x32xbf16>, vector<32x64xbf16>, vector<16x64xf32> -> vector<16x64xf32>
    %c0_4 = arith.constant 0 : index
    %c0_5 = arith.constant 0 : index
    %6 = vector.load %arg6[%c0_4, %c0_5] : memref<1x64xf32, #tpu.memory_space<vmem>>, vector<1x64xf32>
    %7 = vector.broadcast %6 : vector<1x64xf32> to vector<16x64xf32>
    %8 = arith.addf %5, %7 : vector<16x64xf32>
    %c0_6 = arith.constant 0 : index
    %c0_7 = arith.constant 0 : index
    %9 = vector.load %arg7[%c0_6, %c0_7] : memref<16x64xf32, #tpu.memory_space<vmem>>, vector<16x64xf32>
    tpu.vector_store %arg7[%c0_6, %c0_7], %8 {strides = array<i32>} : memref<16x64xf32, #tpu.memory_space<vmem>>, vector<16x64xf32>,
    return
  }
  func.func @transform_0(%arg0: i32, %arg1: i32) -> (i32, i32) {
    %c0_i32 = arith.constant 0 : i32
    %c0_i32_0 = arith.constant 0 : i32
    return %arg0, %c0_i32 : i32, i32
  }
  func.func @transform_1(%arg0: i32, %arg1: i32) -> (i32, i32) {
    %c0_i32 = arith.constant 0 : i32
    %c0_i32_0 = arith.constant 0 : i32
    %c0_i32_1 = arith.constant 0 : i32
    return %c0_i32, %c0_i32_0 : i32, i32
  }
  func.func @transform_2(%arg0: i32, %arg1: i32) -> (i32, i32) {
    %c0_i32 = arith.constant 0 : i32
    %c0_i32_0 = arith.constant 0 : i32
    %c0_i32_1 = arith.constant 0 : i32
    return %c0_i32, %c0_i32_0 : i32, i32
  }
  func.func @transform_3(%arg0: i32, %arg1: i32) -> (i32, i32) {
    %c0_i32 = arith.constant 0 : i32
    %c0_i32_0 = arith.constant 0 : i32
    return %c0_i32, %arg1 : i32, i32
  }
  func.func @transform_4(%arg0: i32, %arg1: i32) -> (i32, i32) {
    %c0_i32 = arith.constant 0 : i32
    %c0_i32_0 = arith.constant 0 : i32
    return %c0_i32, %arg1 : i32, i32
  }
  func.func @transform_5(%arg0: i32, %arg1: i32) -> (i32, i32) {
    %c0_i32 = arith.constant 0 : i32
    return %arg0, %arg1 : i32, i32
  }
}

module attributes {stable_mosaic.version = 11 : i64} {
  func.func @_block_kernel(%arg0: i32, %arg1: i32, %arg2: memref<1x8x32xbf16, #tpu.memory_space<vmem>>, %arg3: memref<32x96xbf16, #tpu.memory_space<vmem>>, %arg4: memref<1x96xf32, #tpu.memory_space<vmem>>, %arg5: memref<32x32xbf16, #tpu.memory_space<vmem>>, %arg6: memref<1x32xf32, #tpu.memory_space<vmem>>, %arg7: memref<1x32xf32, #tpu.memory_space<vmem>>, %arg8: memref<1x32xf32, #tpu.memory_space<vmem>>, %arg9: memref<32x4xbf16, #tpu.memory_space<vmem>>, %arg10: memref<1x4xf32, #tpu.memory_space<vmem>>, %arg11: memref<1x32x128xbf16, #tpu.memory_space<vmem>>, %arg12: memref<1x1x128xf32, #tpu.memory_space<vmem>>, %arg13: memref<1x128x32xbf16, #tpu.memory_space<vmem>>, %arg14: memref<1x1x32xf32, #tpu.memory_space<vmem>>, %arg15: memref<1x32xf32, #tpu.memory_space<vmem>>, %arg16: memref<1x32xf32, #tpu.memory_space<vmem>>, %arg17: memref<1x8x32xbf16, #tpu.memory_space<vmem>>, %arg18: memref<1x1x128xf32, #tpu.memory_space<vmem>>, %arg19: memref<1x1x128xf32, #tpu.memory_space<vmem>>, %arg20: memref<8x32xf32, #tpu.memory_space<vmem>>, %arg21: memref<8x32xbf16, #tpu.memory_space<vmem>>, %arg22: memref<8x4xf32, #tpu.memory_space<vmem>>, %arg23: memref<8x32xf32, #tpu.memory_space<vmem>>) attributes {dimension_semantics = [#tpu.dimension_semantics<parallel>, #tpu.dimension_semantics<arbitrary>], iteration_bounds = array<i64: 2, 4>, scalar_prefetch = 0 : i64, scratch_operands = 4 : i64, tpu.core_type = #tpu.core_type<tc>, window_params = [{transform_indices = @transform_0, window_bounds = array<i64: 1, 8, 32>}, {pipeline_mode = #tpu.pipeline_mode<synchronous>, transform_indices = @transform_1, window_bounds = array<i64: 32, 96>}, {pipeline_mode = #tpu.pipeline_mode<synchronous>, transform_indices = @transform_2, window_bounds = array<i64: 1, 96>}, {pipeline_mode = #tpu.pipeline_mode<synchronous>, transform_indices = @transform_3, window_bounds = array<i64: 32, 32>}, {pipeline_mode = #tpu.pipeline_mode<synchronous>, transform_indices = @transform_4, window_bounds = array<i64: 1, 32>}, {pipeline_mode = #tpu.pipeline_mode<synchronous>, transform_indices = @transform_5, window_bounds = array<i64: 1, 32>}, {pipeline_mode = #tpu.pipeline_mode<synchronous>, transform_indices = @transform_6, window_bounds = array<i64: 1, 32>}, {pipeline_mode = #tpu.pipeline_mode<synchronous>, transform_indices = @transform_7, window_bounds = array<i64: 32, 4>}, {pipeline_mode = #tpu.pipeline_mode<synchronous>, transform_indices = @transform_8, window_bounds = array<i64: 1, 4>}, {transform_indices = @transform_9, window_bounds = array<i64: 1, 32, 128>}, {transform_indices = @transform_10, window_bounds = array<i64: 1, 1, 128>}, {transform_indices = @transform_11, window_bounds = array<i64: 1, 128, 32>}, {transform_indices = @transform_12, window_bounds = array<i64: 1, 1, 32>}, {pipeline_mode = #tpu.pipeline_mode<synchronous>, transform_indices = @transform_13, window_bounds = array<i64: 1, 32>}, {pipeline_mode = #tpu.pipeline_mode<synchronous>, transform_indices = @transform_14, window_bounds = array<i64: 1, 32>}, {transform_indices = @transform_15, window_bounds = array<i64: 1, 8, 32>}, {transform_indices = @transform_16, window_bounds = array<i64: 1, 1, 128>}, {transform_indices = @transform_17, window_bounds = array<i64: 1, 1, 128>}]} {
    %c0_i32 = arith.constant 0 : i32
    %0 = arith.cmpi eq, %arg1, %c0_i32 : i32
    %1 = arith.extui %0 : i1 to i32
    %c0_i32_0 = arith.constant 0 : i32
    %2 = arith.cmpi ne, %1, %c0_i32_0 : i32
    scf.if %2 {
      %c0_25 = arith.constant 0 : index
      %c0_26 = arith.constant 0 : index
      %c0_27 = arith.constant 0 : index
      %37 = vector.load %arg2[%c0_25, %c0_26, %c0_27] : memref<1x8x32xbf16, #tpu.memory_space<vmem>>, vector<1x8x32xbf16>
      %38 = vector.shape_cast %37 : vector<1x8x32xbf16> to vector<8x32xbf16>
      %c0_28 = arith.constant 0 : index
      %c0_29 = arith.constant 0 : index
      %39 = vector.load %arg3[%c0_28, %c0_29] : memref<32x96xbf16, #tpu.memory_space<vmem>>, vector<32x96xbf16>
      %cst_30 = arith.constant dense<0.000000e+00> : vector<8x96xf32>
      %40 = tpu.matmul %38, %39, %cst_30 {dimension_numbers = #tpu.dot_dimension_numbers<[1], [0], [0], [1], [0, 0, 1, 1], [], []>} : vector<8x32xbf16>, vector<32x96xbf16>, vector<8x96xf32> -> vector<8x96xf32>
      %c0_31 = arith.constant 0 : index
      %c0_32 = arith.constant 0 : index
      %41 = vector.load %arg4[%c0_31, %c0_32] : memref<1x96xf32, #tpu.memory_space<vmem>>, vector<1x96xf32>
      %42 = vector.broadcast %41 : vector<1x96xf32> to vector<8x96xf32>
      %43 = arith.addf %40, %42 : vector<8x96xf32>
      %44 = arith.truncf %43 : vector<8x96xf32> to vector<8x96xbf16>
      %45 = vector.extract_strided_slice %44 {offsets = [0, 0], sizes = [8, 8], strides = [1, 1]} : vector<8x96xbf16> to vector<8x8xbf16>
      %46 = vector.extract_strided_slice %44 {offsets = [0, 8], sizes = [8, 8], strides = [1, 1]} : vector<8x96xbf16> to vector<8x8xbf16>
      %47 = vector.extract_strided_slice %44 {offsets = [0, 16], sizes = [8, 8], strides = [1, 1]} : vector<8x96xbf16> to vector<8x8xbf16>
      %48 = vector.extract_strided_slice %44 {offsets = [0, 24], sizes = [8, 8], strides = [1, 1]} : vector<8x96xbf16> to vector<8x8xbf16>
      %49 = vector.shape_cast %45 : vector<8x8xbf16> to vector<1x8x8xbf16>
      %50 = vector.shape_cast %46 : vector<8x8xbf16> to vector<1x8x8xbf16>
      %51 = vector.shape_cast %47 : vector<8x8xbf16> to vector<1x8x8xbf16>
      %52 = vector.shape_cast %48 : vector<8x8xbf16> to vector<1x8x8xbf16>
      %53 = tpu.concatenate %49, %50, %51, %52 in 0 : vector<1x8x8xbf16>, vector<1x8x8xbf16>, vector<1x8x8xbf16>, vector<1x8x8xbf16> -> vector<4x8x8xbf16>
      %54 = vector.extract_strided_slice %44 {offsets = [0, 32], sizes = [8, 8], strides = [1, 1]} : vector<8x96xbf16> to vector<8x8xbf16>
      %55 = vector.extract_strided_slice %44 {offsets = [0, 40], sizes = [8, 8], strides = [1, 1]} : vector<8x96xbf16> to vector<8x8xbf16>
      %56 = vector.extract_strided_slice %44 {offsets = [0, 48], sizes = [8, 8], strides = [1, 1]} : vector<8x96xbf16> to vector<8x8xbf16>
      %57 = vector.extract_strided_slice %44 {offsets = [0, 56], sizes = [8, 8], strides = [1, 1]} : vector<8x96xbf16> to vector<8x8xbf16>
      %58 = vector.shape_cast %54 : vector<8x8xbf16> to vector<1x8x8xbf16>
      %59 = vector.shape_cast %55 : vector<8x8xbf16> to vector<1x8x8xbf16>
      %60 = vector.shape_cast %56 : vector<8x8xbf16> to vector<1x8x8xbf16>
      %61 = vector.shape_cast %57 : vector<8x8xbf16> to vector<1x8x8xbf16>
      %62 = tpu.concatenate %58, %59, %60, %61 in 0 : vector<1x8x8xbf16>, vector<1x8x8xbf16>, vector<1x8x8xbf16>, vector<1x8x8xbf16> -> vector<4x8x8xbf16>
      %63 = vector.extract_strided_slice %44 {offsets = [0, 64], sizes = [8, 8], strides = [1, 1]} : vector<8x96xbf16> to vector<8x8xbf16>
      %64 = vector.extract_strided_slice %44 {offsets = [0, 72], sizes = [8, 8], strides = [1, 1]} : vector<8x96xbf16> to vector<8x8xbf16>
      %65 = vector.extract_strided_slice %44 {offsets = [0, 80], sizes = [8, 8], strides = [1, 1]} : vector<8x96xbf16> to vector<8x8xbf16>
      %66 = vector.extract_strided_slice %44 {offsets = [0, 88], sizes = [8, 8], strides = [1, 1]} : vector<8x96xbf16> to vector<8x8xbf16>
      %67 = vector.shape_cast %63 : vector<8x8xbf16> to vector<1x8x8xbf16>
      %68 = vector.shape_cast %64 : vector<8x8xbf16> to vector<1x8x8xbf16>
      %69 = vector.shape_cast %65 : vector<8x8xbf16> to vector<1x8x8xbf16>
      %70 = vector.shape_cast %66 : vector<8x8xbf16> to vector<1x8x8xbf16>
      %71 = tpu.concatenate %67, %68, %69, %70 in 0 : vector<1x8x8xbf16>, vector<1x8x8xbf16>, vector<1x8x8xbf16>, vector<1x8x8xbf16> -> vector<4x8x8xbf16>
      %72 = tpu.iota {dimensions = array<i32: 0>} : vector<8x8xi32>
      %73 = tpu.iota {dimensions = array<i32: 1>} : vector<8x8xi32>
      %74 = arith.cmpi sle, %73, %72 : vector<8x8xi32>
      %75 = vector.shape_cast %74 : vector<8x8xi1> to vector<1x8x8xi1>
      "tpu.trace_start"() <{level = 10 : i32, message = "htd,hsd->hts"}> : () -> ()
      %cst_33 = arith.constant dense<0.000000e+00> : vector<4x8x8xf32>
      %76 = tpu.matmul %53, %62, %cst_33 {dimension_numbers = #tpu.dot_dimension_numbers<[2], [2], [1], [1], [0, 0, 0, 1, 1, 1], [0], [0]>} : vector<4x8x8xbf16>, vector<4x8x8xbf16>, vector<4x8x8xf32> -> vector<4x8x8xf32>
      "tpu.trace_stop"() : () -> ()
      %cst_34 = arith.constant 0.353553385 : f32
      %77 = vector.broadcast %cst_34 : f32 to vector<4x8x8xf32>
      %78 = arith.mulf %76, %77 : vector<4x8x8xf32>
      %cst_35 = arith.constant -1.000000e+30 : f32
      %79 = vector.shape_cast %75 : vector<1x8x8xi1> to vector<1x8x8xi1>
      %80 = vector.broadcast %79 : vector<1x8x8xi1> to vector<4x8x8xi1>
      %81 = vector.broadcast %cst_35 : f32 to vector<4x8x8xf32>
      %82 = arith.select %80, %78, %81 : vector<4x8x8xi1>, vector<4x8x8xf32>
      %cst_36 = arith.constant dense<0xFF800000> : vector<4x8xf32>
      %83 = vector.multi_reduction <maximumf>, %82, %cst_36 [2] : vector<4x8x8xf32> to vector<4x8xf32>
      %84 = vector.shape_cast %83 : vector<4x8xf32> to vector<4x8x1xf32>
      %85 = vector.broadcast %84 : vector<4x8x1xf32> to vector<4x8x8xf32>
      %86 = arith.subf %82, %85 : vector<4x8x8xf32>
      %87 = math.exp %86 : vector<4x8x8xf32>
      %cst_37 = arith.constant dense<0.000000e+00> : vector<4x8xf32>
      %88 = vector.multi_reduction <add>, %87, %cst_37 [2] : vector<4x8x8xf32> to vector<4x8xf32>
      %89 = vector.shape_cast %88 : vector<4x8xf32> to vector<4x8x1xf32>
      %90 = vector.broadcast %89 : vector<4x8x1xf32> to vector<4x8x8xf32>
      %91 = arith.divf %87, %90 : vector<4x8x8xf32>
      %92 = arith.truncf %91 : vector<4x8x8xf32> to vector<4x8x8xbf16>
      "tpu.trace_start"() <{level = 10 : i32, message = "hts,hsd->htd"}> : () -> ()
      %cst_38 = arith.constant dense<0.000000e+00> : vector<4x8x8xf32>
      %93 = tpu.matmul %92, %71, %cst_38 {dimension_numbers = #tpu.dot_dimension_numbers<[2], [1], [1], [2], [0, 0, 0, 1, 1, 2], [0], [0]>} : vector<4x8x8xbf16>, vector<4x8x8xbf16>, vector<4x8x8xf32> -> vector<4x8x8xf32>
      "tpu.trace_stop"() : () -> ()
      %94 = vector.extract_strided_slice %93 {offsets = [0, 0, 0], sizes = [1, 8, 8], strides = [1, 1, 1]} : vector<4x8x8xf32> to vector<1x8x8xf32>
      %95 = vector.shape_cast %94 : vector<1x8x8xf32> to vector<8x8xf32>
      %96 = vector.extract_strided_slice %93 {offsets = [1, 0, 0], sizes = [1, 8, 8], strides = [1, 1, 1]} : vector<4x8x8xf32> to vector<1x8x8xf32>
      %97 = vector.shape_cast %96 : vector<1x8x8xf32> to vector<8x8xf32>
      %98 = vector.extract_strided_slice %93 {offsets = [2, 0, 0], sizes = [1, 8, 8], strides = [1, 1, 1]} : vector<4x8x8xf32> to vector<1x8x8xf32>
      %99 = vector.shape_cast %98 : vector<1x8x8xf32> to vector<8x8xf32>
      %100 = vector.extract_strided_slice %93 {offsets = [3, 0, 0], sizes = [1, 8, 8], strides = [1, 1, 1]} : vector<4x8x8xf32> to vector<1x8x8xf32>
      %101 = vector.shape_cast %100 : vector<1x8x8xf32> to vector<8x8xf32>
      %102 = tpu.concatenate %95, %97, %99, %101 in 1 : vector<8x8xf32>, vector<8x8xf32>, vector<8x8xf32>, vector<8x8xf32> -> vector<8x32xf32>
      %103 = arith.truncf %102 : vector<8x32xf32> to vector<8x32xbf16>
      %c0_39 = arith.constant 0 : index
      %c0_40 = arith.constant 0 : index
      %104 = vector.load %arg5[%c0_39, %c0_40] : memref<32x32xbf16, #tpu.memory_space<vmem>>, vector<32x32xbf16>
      %cst_41 = arith.constant dense<0.000000e+00> : vector<8x32xf32>
      %105 = tpu.matmul %103, %104, %cst_41 {dimension_numbers = #tpu.dot_dimension_numbers<[1], [0], [0], [1], [0, 0, 1, 1], [], []>} : vector<8x32xbf16>, vector<32x32xbf16>, vector<8x32xf32> -> vector<8x32xf32>
      %c0_42 = arith.constant 0 : index
      %c0_43 = arith.constant 0 : index
      %106 = vector.load %arg6[%c0_42, %c0_43] : memref<1x32xf32, #tpu.memory_space<vmem>>, vector<1x32xf32>
      %107 = vector.broadcast %106 : vector<1x32xf32> to vector<8x32xf32>
      %108 = arith.addf %105, %107 : vector<8x32xf32>
      %109 = arith.extf %38 : vector<8x32xbf16> to vector<8x32xf32>
      %110 = arith.addf %109, %108 : vector<8x32xf32>
      %c0_44 = arith.constant 0 : index
      %c0_45 = arith.constant 0 : index
      %111 = vector.load %arg7[%c0_44, %c0_45] : memref<1x32xf32, #tpu.memory_space<vmem>>, vector<1x32xf32>
      %c0_46 = arith.constant 0 : index
      %c0_47 = arith.constant 0 : index
      %112 = vector.load %arg8[%c0_46, %c0_47] : memref<1x32xf32, #tpu.memory_space<vmem>>, vector<1x32xf32>
      %cst_48 = arith.constant dense<0.000000e+00> : vector<8xf32>
      %113 = vector.multi_reduction <add>, %110, %cst_48 [1] : vector<8x32xf32> to vector<8xf32>
      %114 = vector.shape_cast %113 : vector<8xf32> to vector<8x1xf32>
      %cst_49 = arith.constant 3.200000e+01 : f32
      %115 = vector.broadcast %cst_49 : f32 to vector<8x1xf32>
      %116 = arith.divf %114, %115 : vector<8x1xf32>
      %117 = vector.broadcast %116 : vector<8x1xf32> to vector<8x32xf32>
      %118 = arith.subf %110, %117 : vector<8x32xf32>
      %119 = arith.mulf %118, %118 : vector<8x32xf32>
      %cst_50 = arith.constant dense<0.000000e+00> : vector<8xf32>
      %120 = vector.multi_reduction <add>, %119, %cst_50 [1] : vector<8x32xf32> to vector<8xf32>
      %121 = vector.shape_cast %120 : vector<8xf32> to vector<8x1xf32>
      %cst_51 = arith.constant 3.200000e+01 : f32
      %122 = vector.broadcast %cst_51 : f32 to vector<8x1xf32>
      %123 = arith.divf %121, %122 : vector<8x1xf32>
      %124 = vector.broadcast %116 : vector<8x1xf32> to vector<8x32xf32>
      %125 = arith.subf %110, %124 : vector<8x32xf32>
      %cst_52 = arith.constant 9.99999974E-6 : f32
      %126 = vector.broadcast %cst_52 : f32 to vector<8x1xf32>
      %127 = arith.addf %123, %126 : vector<8x1xf32>
      %128 = math.rsqrt %127 : vector<8x1xf32>
      %129 = vector.broadcast %128 : vector<8x1xf32> to vector<8x32xf32>
      %130 = arith.mulf %125, %129 : vector<8x32xf32>
      %131 = vector.broadcast %111 : vector<1x32xf32> to vector<8x32xf32>
      %132 = arith.mulf %130, %131 : vector<8x32xf32>
      %133 = vector.broadcast %112 : vector<1x32xf32> to vector<8x32xf32>
      %134 = arith.addf %132, %133 : vector<8x32xf32>
      %135 = arith.truncf %134 : vector<8x32xf32> to vector<8x32xbf16>
      %c0_53 = arith.constant 0 : index
      %c0_54 = arith.constant 0 : index
      %136 = vector.load %arg20[%c0_53, %c0_54] : memref<8x32xf32, #tpu.memory_space<vmem>>, vector<8x32xf32>
      tpu.vector_store %arg20[%c0_53, %c0_54], %134 {strides = array<i32>} : memref<8x32xf32, #tpu.memory_space<vmem>>, vector<8x32xf32>,
      %c0_55 = arith.constant 0 : index
      %c0_56 = arith.constant 0 : index
      %137 = vector.load %arg21[%c0_55, %c0_56] : memref<8x32xbf16, #tpu.memory_space<vmem>>, vector<8x32xbf16>
      tpu.vector_store %arg21[%c0_55, %c0_56], %135 {strides = array<i32>} : memref<8x32xbf16, #tpu.memory_space<vmem>>, vector<8x32xbf16>,
      %c0_57 = arith.constant 0 : index
      %c0_58 = arith.constant 0 : index
      %138 = vector.load %arg9[%c0_57, %c0_58] : memref<32x4xbf16, #tpu.memory_space<vmem>>, vector<32x4xbf16>
      %cst_59 = arith.constant dense<0.000000e+00> : vector<8x4xf32>
      %139 = tpu.matmul %135, %138, %cst_59 {dimension_numbers = #tpu.dot_dimension_numbers<[1], [0], [0], [1], [0, 0, 1, 1], [], []>} : vector<8x32xbf16>, vector<32x4xbf16>, vector<8x4xf32> -> vector<8x4xf32>
      %c0_60 = arith.constant 0 : index
      %c0_61 = arith.constant 0 : index
      %140 = vector.load %arg10[%c0_60, %c0_61] : memref<1x4xf32, #tpu.memory_space<vmem>>, vector<1x4xf32>
      %141 = vector.broadcast %140 : vector<1x4xf32> to vector<8x4xf32>
      %142 = arith.addf %139, %141 : vector<8x4xf32>
      %cst_62 = arith.constant dense<0xFF800000> : vector<8xf32>
      %143 = vector.multi_reduction <maximumf>, %142, %cst_62 [1] : vector<8x4xf32> to vector<8xf32>
      %144 = vector.shape_cast %143 : vector<8xf32> to vector<8x1xf32>
      %145 = vector.broadcast %144 : vector<8x1xf32> to vector<8x4xf32>
      %146 = arith.cmpf oge, %142, %145 : vector<8x4xf32>
      %cst_63 = arith.constant -1.000000e+30 : f32
      %147 = vector.broadcast %cst_63 : f32 to vector<8x4xf32>
      %148 = arith.select %146, %147, %142 : vector<8x4xi1>, vector<8x4xf32>
      %cst_64 = arith.constant dense<0xFF800000> : vector<8xf32>
      %149 = vector.multi_reduction <maximumf>, %148, %cst_64 [1] : vector<8x4xf32> to vector<8xf32>
      %150 = vector.shape_cast %149 : vector<8xf32> to vector<8x1xf32>
      %151 = vector.broadcast %150 : vector<8x1xf32> to vector<8x4xf32>
      %152 = arith.cmpf oge, %142, %151 : vector<8x4xf32>
      %cst_65 = arith.constant -1.000000e+30 : f32
      %153 = vector.broadcast %cst_65 : f32 to vector<8x4xf32>
      %154 = arith.select %152, %142, %153 : vector<8x4xi1>, vector<8x4xf32>
      %cst_66 = arith.constant dense<0xFF800000> : vector<8xf32>
      %155 = vector.multi_reduction <maximumf>, %154, %cst_66 [1] : vector<8x4xf32> to vector<8xf32>
      %156 = vector.shape_cast %155 : vector<8xf32> to vector<8x1xf32>
      %157 = vector.broadcast %156 : vector<8x1xf32> to vector<8x4xf32>
      %158 = arith.subf %154, %157 : vector<8x4xf32>
      %159 = math.exp %158 : vector<8x4xf32>
      %cst_67 = arith.constant dense<0.000000e+00> : vector<8xf32>
      %160 = vector.multi_reduction <add>, %159, %cst_67 [1] : vector<8x4xf32> to vector<8xf32>
      %161 = vector.shape_cast %160 : vector<8xf32> to vector<8x1xf32>
      %162 = vector.broadcast %161 : vector<8x1xf32> to vector<8x4xf32>
      %163 = arith.divf %159, %162 : vector<8x4xf32>
      %c0_68 = arith.constant 0 : index
      %c0_69 = arith.constant 0 : index
      %164 = vector.load %arg22[%c0_68, %c0_69] : memref<8x4xf32, #tpu.memory_space<vmem>>, vector<8x4xf32>
      tpu.vector_store %arg22[%c0_68, %c0_69], %163 {strides = array<i32>} : memref<8x4xf32, #tpu.memory_space<vmem>>, vector<8x4xf32>,
      %cst_70 = arith.constant dense<0xFF800000> : vector<8xf32>
      %165 = vector.multi_reduction <maximumf>, %142, %cst_70 [1] : vector<8x4xf32> to vector<8xf32>
      %166 = vector.shape_cast %165 : vector<8xf32> to vector<8x1xf32>
      %167 = vector.broadcast %166 : vector<8x1xf32> to vector<8x4xf32>
      %168 = arith.subf %142, %167 : vector<8x4xf32>
      %169 = math.exp %168 : vector<8x4xf32>
      %cst_71 = arith.constant dense<0.000000e+00> : vector<8xf32>
      %170 = vector.multi_reduction <add>, %169, %cst_71 [1] : vector<8x4xf32> to vector<8xf32>
      %171 = vector.shape_cast %170 : vector<8xf32> to vector<8x1xf32>
      %172 = vector.broadcast %171 : vector<8x1xf32> to vector<8x4xf32>
      %173 = arith.divf %169, %172 : vector<8x4xf32>
      %174 = arith.extui %152 : vector<8x4xi1> to vector<8x4xi32>
      %175 = arith.sitofp %174 : vector<8x4xi32> to vector<8x4xf32>
      %cst_72 = arith.constant dense<0.000000e+00> : vector<4xf32>
      %176 = vector.multi_reduction <add>, %175, %cst_72 [0] : vector<8x4xf32> to vector<4xf32>
      %177 = vector.shape_cast %176 : vector<4xf32> to vector<1x4xf32>
      %cst_73 = arith.constant dense<0.000000e+00> : vector<4xf32>
      %178 = vector.multi_reduction <add>, %173, %cst_73 [0] : vector<8x4xf32> to vector<4xf32>
      %179 = vector.shape_cast %178 : vector<4xf32> to vector<1x4xf32>
      %cst_74 = arith.constant 0.000000e+00 : f32
      %180 = vector.broadcast %cst_74 : f32 to vector<1x124xf32>
      %181 = tpu.concatenate %177, %180 in 1 : vector<1x4xf32>, vector<1x124xf32> -> vector<1x128xf32>
      %182 = tpu.concatenate %179, %180 in 1 : vector<1x4xf32>, vector<1x124xf32> -> vector<1x128xf32>
      %c0_75 = arith.constant 0 : index
      %c0_76 = arith.constant 0 : index
      %c0_77 = arith.constant 0 : index
      %183 = vector.load %arg18[%c0_75, %c0_76, %c0_77] : memref<1x1x128xf32, #tpu.memory_space<vmem>>, vector<1x1x128xf32>
      %184 = vector.shape_cast %183 : vector<1x1x128xf32> to vector<1x128xf32>
      %185 = vector.shape_cast %181 : vector<1x128xf32> to vector<1x1x128xf32>
      tpu.vector_store %arg18[%c0_75, %c0_76, %c0_77], %185 {strides = array<i32>} : memref<1x1x128xf32, #tpu.memory_space<vmem>>, vector<1x1x128xf32>,
      %c0_78 = arith.constant 0 : index
      %c0_79 = arith.constant 0 : index
      %c0_80 = arith.constant 0 : index
      %186 = vector.load %arg19[%c0_78, %c0_79, %c0_80] : memref<1x1x128xf32, #tpu.memory_space<vmem>>, vector<1x1x128xf32>
      %187 = vector.shape_cast %186 : vector<1x1x128xf32> to vector<1x128xf32>
      %188 = vector.shape_cast %182 : vector<1x128xf32> to vector<1x1x128xf32>
      tpu.vector_store %arg19[%c0_78, %c0_79, %c0_80], %188 {strides = array<i32>} : memref<1x1x128xf32, #tpu.memory_space<vmem>>, vector<1x1x128xf32>,
      %cst_81 = arith.constant 0.000000e+00 : f32
      %189 = vector.broadcast %cst_81 : f32 to vector<8x32xf32>
      %c0_82 = arith.constant 0 : index
      %c0_83 = arith.constant 0 : index
      %190 = vector.load %arg23[%c0_82, %c0_83] : memref<8x32xf32, #tpu.memory_space<vmem>>, vector<8x32xf32>
      tpu.vector_store %arg23[%c0_82, %c0_83], %189 {strides = array<i32>} : memref<8x32xf32, #tpu.memory_space<vmem>>, vector<8x32xf32>,
    } else {
    }
    %c0 = arith.constant 0 : index
    %c0_1 = arith.constant 0 : index
    %3 = vector.load %arg21[%c0, %c0_1] : memref<8x32xbf16, #tpu.memory_space<vmem>>, vector<8x32xbf16>
    %c0_2 = arith.constant 0 : index
    %c0_3 = arith.constant 0 : index
    %c0_4 = arith.constant 0 : index
    %4 = vector.load %arg11[%c0_2, %c0_3, %c0_4] : memref<1x32x128xbf16, #tpu.memory_space<vmem>>, vector<1x32x128xbf16>
    %5 = vector.shape_cast %4 : vector<1x32x128xbf16> to vector<32x128xbf16>
    %cst = arith.constant dense<0.000000e+00> : vector<8x128xf32>
    %6 = tpu.matmul %3, %5, %cst {dimension_numbers = #tpu.dot_dimension_numbers<[1], [0], [0], [1], [0, 0, 1, 1], [], []>} : vector<8x32xbf16>, vector<32x128xbf16>, vector<8x128xf32> -> vector<8x128xf32>
    %c0_5 = arith.constant 0 : index
    %c0_6 = arith.constant 0 : index
    %c0_7 = arith.constant 0 : index
    %7 = vector.load %arg12[%c0_5, %c0_6, %c0_7] : memref<1x1x128xf32, #tpu.memory_space<vmem>>, vector<1x1x128xf32>
    %8 = vector.shape_cast %7 : vector<1x1x128xf32> to vector<1x128xf32>
    %9 = vector.broadcast %8 : vector<1x128xf32> to vector<8x128xf32>
    %10 = arith.addf %6, %9 : vector<8x128xf32>
    %cst_8 = arith.constant 0.000000e+00 : f32
    %11 = vector.broadcast %cst_8 : f32 to vector<8x128xf32>
    %12 = arith.maximumf %10, %11 : vector<8x128xf32>
    %13 = arith.truncf %12 : vector<8x128xf32> to vector<8x128xbf16>
    %c0_9 = arith.constant 0 : index
    %c0_10 = arith.constant 0 : index
    %c0_11 = arith.constant 0 : index
    %14 = vector.load %arg13[%c0_9, %c0_10, %c0_11] : memref<1x128x32xbf16, #tpu.memory_space<vmem>>, vector<1x128x32xbf16>
    %15 = vector.shape_cast %14 : vector<1x128x32xbf16> to vector<128x32xbf16>
    %cst_12 = arith.constant dense<0.000000e+00> : vector<8x32xf32>
    %16 = tpu.matmul %13, %15, %cst_12 {dimension_numbers = #tpu.dot_dimension_numbers<[1], [0], [0], [1], [0, 0, 1, 1], [], []>} : vector<8x128xbf16>, vector<128x32xbf16>, vector<8x32xf32> -> vector<8x32xf32>
    %c0_13 = arith.constant 0 : index
    %c0_14 = arith.constant 0 : index
    %c0_15 = arith.constant 0 : index
    %17 = vector.load %arg14[%c0_13, %c0_14, %c0_15] : memref<1x1x32xf32, #tpu.memory_space<vmem>>, vector<1x1x32xf32>
    %18 = vector.shape_cast %17 : vector<1x1x32xf32> to vector<1x32xf32>
    %19 = vector.broadcast %18 : vector<1x32xf32> to vector<8x32xf32>
    %20 = arith.addf %16, %19 : vector<8x32xf32>
    %21 = tpu.iota {dimensions = array<i32: 1>} : vector<8x4xi32>
    %22 = vector.broadcast %arg1 : i32 to vector<8x4xi32>
    %23 = arith.cmpi eq, %21, %22 : vector<8x4xi32>
    %c0_16 = arith.constant 0 : index
    %c0_17 = arith.constant 0 : index
    %24 = vector.load %arg22[%c0_16, %c0_17] : memref<8x4xf32, #tpu.memory_space<vmem>>, vector<8x4xf32>
    %cst_18 = arith.constant 0.000000e+00 : f32
    %25 = vector.broadcast %cst_18 : f32 to vector<8x4xf32>
    %26 = arith.select %23, %24, %25 : vector<8x4xi1>, vector<8x4xf32>
    %cst_19 = arith.constant dense<0.000000e+00> : vector<8xf32>
    %27 = vector.multi_reduction <add>, %26, %cst_19 [1] : vector<8x4xf32> to vector<8xf32>
    %28 = vector.shape_cast %27 : vector<8xf32> to vector<8x1xf32>
    %c0_20 = arith.constant 0 : index
    %c0_21 = arith.constant 0 : index
    %29 = vector.load %arg23[%c0_20, %c0_21] : memref<8x32xf32, #tpu.memory_space<vmem>>, vector<8x32xf32>
    %30 = vector.broadcast %28 : vector<8x1xf32> to vector<8x32xf32>
    %31 = arith.mulf %30, %20 : vector<8x32xf32>
    %32 = arith.addf %29, %31 : vector<8x32xf32>
    %c0_22 = arith.constant 0 : index
    %c0_23 = arith.constant 0 : index
    %33 = vector.load %arg23[%c0_22, %c0_23] : memref<8x32xf32, #tpu.memory_space<vmem>>, vector<8x32xf32>
    tpu.vector_store %arg23[%c0_22, %c0_23], %32 {strides = array<i32>} : memref<8x32xf32, #tpu.memory_space<vmem>>, vector<8x32xf32>,
    %c3_i32 = arith.constant 3 : i32
    %34 = arith.cmpi eq, %arg1, %c3_i32 : i32
    %35 = arith.extui %34 : i1 to i32
    %c0_i32_24 = arith.constant 0 : i32
    %36 = arith.cmpi ne, %35, %c0_i32_24 : i32
    scf.if %36 {
      %c0_25 = arith.constant 0 : index
      %c0_26 = arith.constant 0 : index
      %37 = vector.load %arg20[%c0_25, %c0_26] : memref<8x32xf32, #tpu.memory_space<vmem>>, vector<8x32xf32>
      %c0_27 = arith.constant 0 : index
      %c0_28 = arith.constant 0 : index
      %38 = vector.load %arg23[%c0_27, %c0_28] : memref<8x32xf32, #tpu.memory_space<vmem>>, vector<8x32xf32>
      %39 = arith.addf %37, %38 : vector<8x32xf32>
      %c0_29 = arith.constant 0 : index
      %c0_30 = arith.constant 0 : index
      %40 = vector.load %arg15[%c0_29, %c0_30] : memref<1x32xf32, #tpu.memory_space<vmem>>, vector<1x32xf32>
      %c0_31 = arith.constant 0 : index
      %c0_32 = arith.constant 0 : index
      %41 = vector.load %arg16[%c0_31, %c0_32] : memref<1x32xf32, #tpu.memory_space<vmem>>, vector<1x32xf32>
      %cst_33 = arith.constant dense<0.000000e+00> : vector<8xf32>
      %42 = vector.multi_reduction <add>, %39, %cst_33 [1] : vector<8x32xf32> to vector<8xf32>
      %43 = vector.shape_cast %42 : vector<8xf32> to vector<8x1xf32>
      %cst_34 = arith.constant 3.200000e+01 : f32
      %44 = vector.broadcast %cst_34 : f32 to vector<8x1xf32>
      %45 = arith.divf %43, %44 : vector<8x1xf32>
      %46 = vector.broadcast %45 : vector<8x1xf32> to vector<8x32xf32>
      %47 = arith.subf %39, %46 : vector<8x32xf32>
      %48 = arith.mulf %47, %47 : vector<8x32xf32>
      %cst_35 = arith.constant dense<0.000000e+00> : vector<8xf32>
      %49 = vector.multi_reduction <add>, %48, %cst_35 [1] : vector<8x32xf32> to vector<8xf32>
      %50 = vector.shape_cast %49 : vector<8xf32> to vector<8x1xf32>
      %cst_36 = arith.constant 3.200000e+01 : f32
      %51 = vector.broadcast %cst_36 : f32 to vector<8x1xf32>
      %52 = arith.divf %50, %51 : vector<8x1xf32>
      %53 = vector.broadcast %45 : vector<8x1xf32> to vector<8x32xf32>
      %54 = arith.subf %39, %53 : vector<8x32xf32>
      %cst_37 = arith.constant 9.99999974E-6 : f32
      %55 = vector.broadcast %cst_37 : f32 to vector<8x1xf32>
      %56 = arith.addf %52, %55 : vector<8x1xf32>
      %57 = math.rsqrt %56 : vector<8x1xf32>
      %58 = vector.broadcast %57 : vector<8x1xf32> to vector<8x32xf32>
      %59 = arith.mulf %54, %58 : vector<8x32xf32>
      %60 = vector.broadcast %40 : vector<1x32xf32> to vector<8x32xf32>
      %61 = arith.mulf %59, %60 : vector<8x32xf32>
      %62 = vector.broadcast %41 : vector<1x32xf32> to vector<8x32xf32>
      %63 = arith.addf %61, %62 : vector<8x32xf32>
      %64 = arith.truncf %63 : vector<8x32xf32> to vector<8x32xbf16>
      %c0_38 = arith.constant 0 : index
      %c0_39 = arith.constant 0 : index
      %c0_40 = arith.constant 0 : index
      %65 = vector.load %arg17[%c0_38, %c0_39, %c0_40] : memref<1x8x32xbf16, #tpu.memory_space<vmem>>, vector<1x8x32xbf16>
      %66 = vector.shape_cast %65 : vector<1x8x32xbf16> to vector<8x32xbf16>
      %67 = vector.shape_cast %64 : vector<8x32xbf16> to vector<1x8x32xbf16>
      tpu.vector_store %arg17[%c0_38, %c0_39, %c0_40], %67 {strides = array<i32>} : memref<1x8x32xbf16, #tpu.memory_space<vmem>>, vector<1x8x32xbf16>,
    } else {
    }
    return
  }
  func.func @transform_0(%arg0: i32, %arg1: i32) -> (i32, i32, i32) {
    %c0_i32 = arith.constant 0 : i32
    %c0_i32_0 = arith.constant 0 : i32
    %c0_i32_1 = arith.constant 0 : i32
    return %arg0, %c0_i32, %c0_i32_0 : i32, i32, i32
  }
  func.func @transform_1(%arg0: i32, %arg1: i32) -> (i32, i32) {
    %c0_i32 = arith.constant 0 : i32
    %c0_i32_0 = arith.constant 0 : i32
    %c0_i32_1 = arith.constant 0 : i32
    return %c0_i32, %c0_i32_0 : i32, i32
  }
  func.func @transform_2(%arg0: i32, %arg1: i32) -> (i32, i32) {
    %c0_i32 = arith.constant 0 : i32
    %c0_i32_0 = arith.constant 0 : i32
    %c0_i32_1 = arith.constant 0 : i32
    return %c0_i32, %c0_i32_0 : i32, i32
  }
  func.func @transform_3(%arg0: i32, %arg1: i32) -> (i32, i32) {
    %c0_i32 = arith.constant 0 : i32
    %c0_i32_0 = arith.constant 0 : i32
    %c0_i32_1 = arith.constant 0 : i32
    return %c0_i32, %c0_i32_0 : i32, i32
  }
  func.func @transform_4(%arg0: i32, %arg1: i32) -> (i32, i32) {
    %c0_i32 = arith.constant 0 : i32
    %c0_i32_0 = arith.constant 0 : i32
    %c0_i32_1 = arith.constant 0 : i32
    return %c0_i32, %c0_i32_0 : i32, i32
  }
  func.func @transform_5(%arg0: i32, %arg1: i32) -> (i32, i32) {
    %c0_i32 = arith.constant 0 : i32
    %c0_i32_0 = arith.constant 0 : i32
    %c0_i32_1 = arith.constant 0 : i32
    return %c0_i32, %c0_i32_0 : i32, i32
  }
  func.func @transform_6(%arg0: i32, %arg1: i32) -> (i32, i32) {
    %c0_i32 = arith.constant 0 : i32
    %c0_i32_0 = arith.constant 0 : i32
    %c0_i32_1 = arith.constant 0 : i32
    return %c0_i32, %c0_i32_0 : i32, i32
  }
  func.func @transform_7(%arg0: i32, %arg1: i32) -> (i32, i32) {
    %c0_i32 = arith.constant 0 : i32
    %c0_i32_0 = arith.constant 0 : i32
    %c0_i32_1 = arith.constant 0 : i32
    return %c0_i32, %c0_i32_0 : i32, i32
  }
  func.func @transform_8(%arg0: i32, %arg1: i32) -> (i32, i32) {
    %c0_i32 = arith.constant 0 : i32
    %c0_i32_0 = arith.constant 0 : i32
    %c0_i32_1 = arith.constant 0 : i32
    return %c0_i32, %c0_i32_0 : i32, i32
  }
  func.func @transform_9(%arg0: i32, %arg1: i32) -> (i32, i32, i32) {
    %c0_i32 = arith.constant 0 : i32
    %c0_i32_0 = arith.constant 0 : i32
    %c0_i32_1 = arith.constant 0 : i32
    return %arg1, %c0_i32, %c0_i32_0 : i32, i32, i32
  }
  func.func @transform_10(%arg0: i32, %arg1: i32) -> (i32, i32, i32) {
    %c0_i32 = arith.constant 0 : i32
    %c0_i32_0 = arith.constant 0 : i32
    %c0_i32_1 = arith.constant 0 : i32
    return %arg1, %c0_i32, %c0_i32_0 : i32, i32, i32
  }
  func.func @transform_11(%arg0: i32, %arg1: i32) -> (i32, i32, i32) {
    %c0_i32 = arith.constant 0 : i32
    %c0_i32_0 = arith.constant 0 : i32
    %c0_i32_1 = arith.constant 0 : i32
    return %arg1, %c0_i32, %c0_i32_0 : i32, i32, i32
  }
  func.func @transform_12(%arg0: i32, %arg1: i32) -> (i32, i32, i32) {
    %c0_i32 = arith.constant 0 : i32
    %c0_i32_0 = arith.constant 0 : i32
    %c0_i32_1 = arith.constant 0 : i32
    return %arg1, %c0_i32, %c0_i32_0 : i32, i32, i32
  }
  func.func @transform_13(%arg0: i32, %arg1: i32) -> (i32, i32) {
    %c0_i32 = arith.constant 0 : i32
    %c0_i32_0 = arith.constant 0 : i32
    %c0_i32_1 = arith.constant 0 : i32
    return %c0_i32, %c0_i32_0 : i32, i32
  }
  func.func @transform_14(%arg0: i32, %arg1: i32) -> (i32, i32) {
    %c0_i32 = arith.constant 0 : i32
    %c0_i32_0 = arith.constant 0 : i32
    %c0_i32_1 = arith.constant 0 : i32
    return %c0_i32, %c0_i32_0 : i32, i32
  }
  func.func @transform_15(%arg0: i32, %arg1: i32) -> (i32, i32, i32) {
    %c0_i32 = arith.constant 0 : i32
    %c0_i32_0 = arith.constant 0 : i32
    %c0_i32_1 = arith.constant 0 : i32
    return %arg0, %c0_i32, %c0_i32_0 : i32, i32, i32
  }
  func.func @transform_16(%arg0: i32, %arg1: i32) -> (i32, i32, i32) {
    %c0_i32 = arith.constant 0 : i32
    %c0_i32_0 = arith.constant 0 : i32
    %c0_i32_1 = arith.constant 0 : i32
    return %arg0, %c0_i32, %c0_i32_0 : i32, i32, i32
  }
  func.func @transform_17(%arg0: i32, %arg1: i32) -> (i32, i32, i32) {
    %c0_i32 = arith.constant 0 : i32
    %c0_i32_0 = arith.constant 0 : i32
    %c0_i32_1 = arith.constant 0 : i32
    return %arg0, %c0_i32, %c0_i32_0 : i32, i32, i32
  }
}

</mosaic_0001>

<bundles_post_ra>
// kernel: moe_decoder_forward.5
= control target key start
LH: loop header
LB: loop body
LE: loop exit
PB: predicated region body
PF: predicated region fallthrough
CT: control target
= control target key end

     0   :  { %vm32_vm0 = vcmask 261120   ;;  %s293_s0 = inlined_call_operand.vmem [shape: bf16[16,32], index: 0, kind: input, shape index: {}]   ;;  %s294_s1 = inlined_call_operand.vmem [shape: f32[1,32], index: 1, kind: input, shape index: {}]   ;;  %s295_s2 = inlined_call_operand.vmem [shape: f32[1,32], index: 2, kind: input, shape index: {}]   ;;  %s296_s3 = inlined_call_operand.vmem [shape: bf16[32,64], index: 3, kind: input, shape index: {}]   ;;  %s297_s4 = inlined_call_operand.vmem [shape: f32[1,64], index: 4, kind: input, shape index: {}]   ;;  %s298_s5 = inlined_call_operand.hbm [shape: f32[16,64], index: 5, kind: output, shape index: {}]  }
   0x1   :  { %v173_v0 = vld [vmem:[%s293_s0] sm:$0xff]  }
   0x2   :  { %v174_v1 = vunpack.c.l.bf16 %v173_v0  ;;  %v175_v2 = vunpack.c.h.bf16 %v173_v0 }
   0x3   :  { %10 = vsyncpa [#allocation4], 0  ;;  %v192_v15 = vld [vmem:[%s296_s3] sm:$0xff]   ;;  %v222_v16 = vmov 0.0   ;;  %v193_v17 = vld [vmem:[%s296_s3 + $0x8] sm:$0xff]   ;;  %vm223_vm1 = vmmov 0  }
   0x4   :  { %v33_v3 = vsel %vm32_vm0, %v174_v1, 0.0  ;;  %v36_v4 = vsel %vm32_vm0, %v175_v2, 0.0  ;;  %179 = vmatprep.subr.bf16.mxu0 %v222_v16  ;;  %183 = vmatprep.mubr.msk.bf16.mxu0 %vm223_vm1, %v222_v16  ;;  %v166_v26 = vld [vmem:[%s294_s1] ss:$0 sm:$0xff]  ;;  %s224_s1 = smov [#allocation3]   ;;  %vm147_vm2 = vcmask 523264  }
   0x5   :  { %34 = vadd.xlane.f32.xlu0 %v33_v3  ;;  %180 = vmatpush3.bf16.msra.mxu0 %v192_v15  ;;  %v167_v30 = vld [vmem:[%s295_s2] ss:$0 sm:$0xff]  ;;  %s155_s28 = sshll.u32 %s224_s1, 4  ;;  %s156_s28 = int_to_ptr.vmem [resolvable:$true] %s155_s28 }
   0x6   :  { %181 = vmatprep.subr.bf16.mxu0 %v222_v16  ;;  %v168_v36 = vld [vmem:[%s297_s4] ss:$0 sm:$0xff]  ;;  %s198_s2 = scalar_lea.vmem %s156_s28, 256  ;;  %p203_p1 = scmp.lt.s32.totalorder %s156_s28, %s156_s28 }
   0x7   :  { %p199_p0 = scmp.ne.s32.totalorder %s156_s28, %s198_s2  ;;  %p204_p2 = scmp.lt.s32.totalorder %s198_s2, %s198_s2 }
   0x9   :  { %37 = vadd.xlane.f32.xlu0 %v36_v4  ;;  %182 = vmatpush3.bf16.msra.mxu0 %v193_v17  ;;  %p205_p3 = por %p204_p2, %p203_p1 }
   0xb   :  { %p206_p4 = pnand %p205_p3, %p199_p0 }
  0x92   :  { %v35_v5 = vpop.xlane.xlu0 %34 }
  0x93   :  { %v40_v6 = vmul.f32 0.03125, %v35_v5 }
  0x95   :  { %v42_v7 = vsub.f32 %v174_v1, %v40_v6 }
  0x96   :  { %v38_v8 = vpop.xlane.xlu0 %37 }
  0x97   :  { %v41_v9 = vmul.f32 0.03125, %v38_v8  ;;  %v44_v10 = vmul.f32 %v42_v7, %v42_v7 }
  0x99   :  { %v43_v11 = vsub.f32 %v175_v2, %v41_v9  ;;  %v46_v12 = vsel %vm32_vm0, %v44_v10, 0.0 }
  0x9a   :  { %47 = vadd.xlane.f32.xlu1 %v46_v12 }
  0x9b   :  { %v45_v13 = vmul.f32 %v43_v11, %v43_v11 }
  0x9d   :  { %v49_v14 = vsel %vm32_vm0, %v45_v13, 0.0 }
  0x9e   :  { %50 = vadd.xlane.f32.xlu1 %v49_v14 }
 0x127   :  { %v48_v18 = vpop.xlane.xlu1 %47 }
 0x128   :  { %v52_v19 = vmul.f32 0.03125, %v48_v18 }
 0x12a   :  { %v54_v20 = vadd.f32 1e-05, %v52_v19 }
 0x12b   :  { %v51_v21 = vpop.xlane.xlu1 %50 }
 0x12c   :  { %194 = vrsqrt.f32 %v54_v20  ;;  %v53_v22 = vmul.f32 0.03125, %v51_v21 }
 0x12e   :  { %v55_v23 = vadd.f32 1e-05, %v53_v22 }
 0x130   :  { %196 = vrsqrt.f32 %v55_v23 }
 0x136   :  { %v195_v24 = vpop.eup %194 }
 0x137   :  { %v58_v25 = vmul.f32 %v195_v24, %v42_v7 }
 0x139   :  { %v66_v28 = vmul.f32 %v166_v26, %v58_v25 }
 0x13a   :  { %v197_v27 = vpop.eup %196 }
 0x13b   :  { %v59_v29 = vmul.f32 %v197_v27, %v43_v11  ;;  %v74_v32 = vadd.f32 %v167_v30, %v66_v28 }
 0x13d   :  { %v67_v31 = vmul.f32 %v166_v26, %v59_v29 }
 0x13f   :  { %v75_v33 = vadd.f32 %v167_v30, %v67_v31 }
 0x141   :  { %v76_v34 = vpack.c.bf16 %v75_v33, %v74_v32 }
 0x143   :  { %77 = vst.msk [vmem:[#allocation2] sm:$0xff] %vm32_vm0, %v76_v34 }
 0x14a   :  { %v78_v35 = vld [vmem:[#allocation2] sm:$0xff] }
 0x14b   :  { %184 = vmatmul.mubr.msk.bf16.vlgmr.msra.gmra.mrb[0].mxu0 %vm32_vm0, %v78_v35 }
 0x21e   :  { %v140_v37 = vpop.f32.mrb[0].mxu0 }
 0x21f   :  { %v141_v38 = vadd.f32 %v168_v36, %v140_v37  ;;  %v185_v39 = vpop.f32.mrb[1].mxu0 }
 0x220   :  { %v143_v40 = vpop.f32.mrb[2].mxu0 }
 0x221   :  { %148 = vst.msk [vmem:[#allocation3] sm:$0xff] %vm147_vm2, %v141_v38  ;;  %v144_v41 = vadd.f32 %v168_v36, %v143_v40  ;;  %v186_v42 = vpop.f32.mrb[3].mxu0 }
 0x223   :  { %149 = vst.msk [vmem:[#allocation3 + $0x8] sm:$0xff] %vm147_vm2, %v144_v41 }
 0x224   :  { %209 = shalt.err (!%p206_p4)
}
 0x225   :  { %s210_s30 = scalar_lea.hbm %s298_s5, 256 }
 0x226   :  { %p211_p5 = scmp.ne.s32.totalorder %s298_s5, %s210_s30  ;;  %p214_p6 = scmp.lt.u32.totalorder %s210_s30, %s298_s5 }
 0x228   :  { %p216_p7 = pnand %p214_p6, %p211_p5 }
 0x22a   :  { %219 = shalt.err (!%p216_p7)
}
 0x22b   :  { %s225_s10 = smov 128   ;;  %s226_s11 = smov 8  }
 0x22c   :  { %161 = dma.vmem_to_hbm [thread:$0]  %s156_s28, 256, %s298_s5, [#allocation4], %s225_s10, %s225_s10, %s226_s11  }
 0x22d   :  { %220 = dma.done.wait [#allocation4], 256  }
 0x22e   :  { %221 = vsyncadd [#allocation4], 4294967040 }
 0x22f   :  { %165 = vsyncpa [#allocation4], 1 }

// kernel: moe_decoder_forward.3
= control target key start
LH: loop header
LB: loop body
LE: loop exit
PB: predicated region body
PF: predicated region fallthrough
CT: control target
= control target key end

     0   :  { %s2230_s24 = smov 0   ;;  %s2232_s25 = smov 0   ;;  %s2512_s0 = inlined_call_operand.vmem [shape: bf16[2,8,32], index: 0, kind: input, shape index: {}]   ;;  %s2513_s1 = inlined_call_operand.vmem [shape: bf16[32,96], index: 1, kind: input, shape index: {}]   ;;  %s2514_s2 = inlined_call_operand.vmem [shape: f32[1,96], index: 2, kind: input, shape index: {}]   ;;  %s2515_s3 = inlined_call_operand.vmem [shape: bf16[32,32], index: 3, kind: input, shape index: {}]   ;;  %s2516_s4 = inlined_call_operand.vmem [shape: f32[1,32], index: 4, kind: input, shape index: {}]   ;;  %s2517_s5 = inlined_call_operand.vmem [shape: f32[1,32], index: 5, kind: input, shape index: {}]   ;;  %s2518_s6 = inlined_call_operand.vmem [shape: f32[1,32], index: 6, kind: input, shape index: {}]   ;;  %s2519_s7 = inlined_call_operand.vmem [shape: bf16[32,4], index: 7, kind: input, shape index: {}]   ;;  %s2520_s8 = inlined_call_operand.vmem [shape: f32[1,4], index: 8, kind: input, shape index: {}]   ;;  %s2521_s9 = inlined_call_operand.vmem [shape: bf16[4,32,128], index: 9, kind: input, shape index: {}]   ;;  %s2522_s10 = inlined_call_operand.vmem [shape: f32[4,1,128], index: 10, kind: input, shape index: {}]   ;;  %s2523_s11 = inlined_call_operand.vmem [shape: bf16[4,128,32], index: 11, kind: input, shape index: {}]   ;;  %s2524_s12 = inlined_call_operand.vmem [shape: f32[4,1,32], index: 12, kind: input, shape index: {}]   ;;  %s2525_s13 = inlined_call_operand.vmem [shape: f32[1,32], index: 13, kind: input, shape index: {}]   ;;  %s2526_s14 = inlined_call_operand.vmem [shape: f32[1,32], index: 14, kind: input, shape index: {}]   ;;  %s2527_s15 = inlined_call_operand.vmem [shape: bf16[2,8,32], index: 15, kind: output, shape index: {0}]   ;;  %s2528_s16 = inlined_call_operand.vmem [shape: f32[2,1,128], index: 16, kind: output, shape index: {1}]   ;;  %s2529_s17 = inlined_call_operand.vmem [shape: f32[2,1,128], index: 17, kind: output, shape index: {2}]  }
   0x1   :  { %2535 = sst [smem:[#allocation11_spill]] %s2512_s0  ;;  %s2234_s26 = smov 0  }
   0x2   :  { %2536 = sst [smem:[#allocation12_spill]] %s2513_s1  ;;  %s2236_s27 = smov 0  }
   0x3   :  { %2537 = sst [smem:[#allocation13_spill]] %s2517_s5  ;;  %s2238_s28 = smov 0  }
   0x4   :  { %2538 = sst [smem:[#allocation14_spill]] %s2518_s6 }
   0x5   :  { %2539 = sst [smem:[#allocation15_spill]] %s2519_s7 }
   0x6   :  { %2540 = sst [smem:[#allocation16_spill]] %s2520_s8 }
   0x7   :  { %2541 = sst [smem:[#allocation17_spill]] %s2525_s13 }
   0x8   :  { %2542 = sst [smem:[#allocation18_spill]] %s2526_s14 }
   0x9 LB: > { %2543 = sst [smem:[#allocation6_spill]] %s2118_s26  ;;  %s37_s29 = sadd.s32 1, %s2118_s26  ;;  %s2126_s28 = sphi %s2238_s28, %s28_s28   ;;  %s2122_s27 = sphi %s2236_s27, %s2561_s27   ;;  %s2118_s26 = sphi %s2234_s26, %s2560_s26   ;;  %s2114_s25 = sphi %s2232_s25, %s2559_s25   ;;  %s2110_s24 = sphi %s2230_s24, %s2558_s24  }
   0xa   : > { %2544 = sst [smem:[#allocation7_spill]] %s2122_s27  ;;  %s40_s0 = sadd.s32 1, %s2122_s27 }
   0xb   : > { %2545 = sst [smem:[#allocation8_spill]] %s2126_s28  ;;  %p38_p0 = scmp.ge.s32.totalorder %s37_s29, 4 }
   0xc   : > { %p1804_p1 = scmp.ge.s32.totalorder %s2126_s28, 1  ;;  %p539_p2 = scmp.lt.s32.totalorder %s2126_s28, 9 }
   0xd   : > { %s2563_s29 = smov (%p38_p0, %s37_s29), 0  ;;  %s2565_s0 = smov (!%p38_p0, %s40_s0), %s2122_s27 }
   0xe   : > { %2546 = sst [smem:[#allocation9_spill]] %s2563_s29  ;;  %p540_p3 = pnand %p1804_p1, %p539_p2 }
   0xf   : > { %p42_p4 = scmp.ge.s32.totalorder %s2565_s0, 2  ;;  %p611_p5 = scmp.lt.s32.totalorder (!%p540_p3), %s2114_s25, 1 }
  0x10   : > { %543 = sbr.rel (%p540_p3) target bundleno = 3488 (0xda0), region = 80  ;;  %p615_p6 = scmp.lt.s32.totalorder (!%p540_p3), %s2110_s24, 3 }
  0x11   : > { %s2567_s0 = smov (%p42_p4, %s2565_s0), 0  ;;  %s2548_s23 = sld [smem:[#allocation11_spill]] (!%p540_p3) }
  0x12   : > { %2547 = sst [smem:[#allocation10_spill]] %s2567_s0  ;;  %p1811_p7 = scmp.ne.s32.totalorder (!%p540_p3), %s2110_s24, 0 }
  0x17   : > { %s2569_s25 = smov (!%p611_p5, %s2114_s25), 1  ;;  %645 = sbr.rel (%p1811_p7) target bundleno = 2717 (0xa9d), region = 84 }
  0x18   : > { %s2266_s30 = scalar_select %p615_p6, %s2110_s24, 3 }
  0x19   : > { %s1805_s18 = sshll.u32 %s2569_s25, 2  ;;  %s640_s13 = scalar_lea.vmem %s2529_s17, %s2569_s25  ;;  %v2128_v1 = vmov (!%p1811_p7), 0.0   ;;  %vm2129_vm0 = vmmov (!%p1811_p7), 0   ;;  %vm670_vm1 = vcmask (!%p1811_p7), 261120   ;;  %v1812_v4 = vld [vmem:[%s2514_s2] ss:$0 sm:$0xff] (!%p1811_p7)  ;;  %v722_v22 = vlaneseq (!%p1811_p7) }
  0x1a   : > { %s614_s0 = scalar_lea.vmem %s2548_s23, %s1805_s18  ;;  %s1853_s29 = sshll.u32 %s2266_s30, 4  ;;  %1892 = vmatprep.subr.bf16.mxu0 (!%p1811_p7), %v2128_v1  ;;  %1900 = vmatprep.subr.bf16.mxu1 (!%p1811_p7), %v2128_v1  ;;  %1408 = vst.msk [vmem:[#allocation5] sm:$0xff] (!%p1811_p7), %vm670_vm1, %v2128_v1  ;;  %vm729_vm2 = vcmask (!%p1811_p7), 64512   ;;  %vm983_vm4 = vcmask (!%p1811_p7), 1043456   ;;  %vm1184_vm5 = vcmask (!%p1811_p7), 130048   ;;  %vm1186_vm6 = vcmask (!%p1811_p7), 195584  }
  0x1b   : > { %s2280_s28 = scalar_lea.vmem %s2521_s9, %s1853_s29  ;;  %s622_s8 = scalar_lea.vmem %s2522_s10, %s2266_s30  ;;  %1896 = vmatprep.mubr.msk.bf16.mxu0 (!%p1811_p7), %vm2129_vm0, %v2128_v1  ;;  %1902 = vmatprep.mubr.msk.bf16.mxu1 (!%p1811_p7), %vm2129_vm0, %v2128_v1  ;;  %v2321_v3 = vld [vmem:[%s614_s0] sm:$0xf] (!%p1811_p7)  ;;  %v723_v23 = vshrl.u32 (!%p1811_p7), %v722_v22, 7  ;;  %v725_v24 = vand.u32 (!%p1811_p7), 127, %v722_v22  ;;  %vm1289_vm7 = vcmask (!%p1811_p7), 257024   ;;  %vm1357_vm8 = vcmask (!%p1811_p7), 31744  }
  0x1c   : > { %s1854_s6 = sshll.u32 %s2266_s30, 6  ;;  %s630_s19 = scalar_lea.vmem %s2524_s12, %s2266_s30 }
  0x1d   : > { %s2294_s21 = scalar_lea.vmem %s2523_s11, %s1854_s6  ;;  %s2299_s26 = scalar_lea.vmem %s2527_s15, %s1805_s18  ;;  %vm726_vm3 = vcmp.le.s32.totalorder (!%p1811_p7), %v725_v24, %v723_v23 }
  0x1e   : > { %s2549_s7 = sld [smem:[#allocation12_spill]]  ;;  %s2130_s0 = smov 104  }
  0x1f   : > { %s2131_s22 = smov 120   ;;  %s2132_s23 = smov 96  }
  0x20   : > { %s2133_s27 = smov 112   ;;  %s2134_s29 = smov 64  }
  0x21   : > { %s2135_s20 = smov 8   ;;  %s2136_s1 = smov 16  }
  0x22   : > { %s2550_s14 = sld [smem:[#allocation15_spill]]  ;;  %s2553_s5 = sld [smem:[#allocation16_spill]] }
  0x24   : > { %v2044_v0 = vld [vmem:[%s2549_s7] sm:$0xff]   ;;  %v2045_v2 = vld [vmem:[%s2549_s7 + $0x8] sm:$0xff]  }
  0x25   : > { %1893 = vmatpush3.bf16.msra.mxu0 %v2044_v0 }
  0x26   : > { %1894 = vmatprep.subr.bf16.mxu0 %v2128_v1 }
  0x29   : > { %1895 = vmatpush3.bf16.msra.mxu0 %v2045_v2 }
  0x2a   : > { %1906 = vmatprep.subr.bf16.mxu0 %v2128_v1 }
  0x2c   : > { %1897 = vmatmul.mubr.msk.bf16.vlgmr.msra.gmra.mrb[0].mxu0 %vm670_vm1, %v2321_v3 }
  0x2d   : > { %1908 = vmatprep.mubr.msk.bf16.mxu0 %vm2129_vm0, %v2128_v1 }
  0xff   : > { %v708_v5 = vpop.f32.mrb[0].mxu0 }
 0x100   : > { %v709_v6 = vadd.f32 %v1812_v4, %v708_v5  ;;  %v1898_v7 = vpop.f32.mrb[1].mxu0 }
 0x101   : > { %v711_v8 = vpop.f32.mrb[2].mxu0 }
 0x102   : > { %v2331_v9 = vpack.c.bf16 %v709_v6, %v709_v6  ;;  %v1899_v10 = vpop.f32.mrb[3].mxu0 }
 0x104   : > { %720 = vrot.lane.b32.xlu1 %v2331_v9, %s2130_s0  ;;  %716 = vrot.lane.b32.xlu0 %v2331_v9, %s2131_s22  ;;  %s2137_s0 = smov 24  }
 0x108   : > { %727 = vrot.lane.b32.xlu1 %v2331_v9, %s2132_s23  ;;  %718 = vrot.lane.b32.xlu0 %v2331_v9, %s2133_s27 }
 0x176   : > { %v2337_v11 = vpop.permute.xlu1 %720  ;;  %v2339_v12 = vpop.permute.xlu0 %716 }
 0x177   : > { %776 = vrot.lane.b32.xlu0 %v2339_v12, %s2132_s23 }
 0x17a   : > { %v728_v13 = vpop.permute.xlu1 %727  ;;  %v2342_v14 = vpop.permute.xlu0 %718 }
 0x17b   : > { %872 = vrot.lane.b32.xlu0 %v2337_v11, %s2132_s23  ;;  %824 = vrot.lane.b32.xlu1 %v2342_v14, %s2132_s23  ;;  %v734_v15 = vsel %vm729_vm2, %v728_v13, 0  ;;  %s2552_s23 = sld [smem:[#allocation14_spill]] }
 0x17c   : > { %1901 = vmatpush3.bf16.xpose.msra.mxu1 %v734_v15 }
 0x17d   : > { %1912 = vmatprep.subr.bf16.mxu1 %v2128_v1 }
 0x183   : > { %1903 = vmatmul.mubr.msk.bf16.vlgmr.msra.gmra.mrb[0].mxu1 %vm729_vm2, %v2331_v9 }
 0x184   : > { %1914 = vmatprep.mubr.msk.bf16.mxu1 %vm2129_vm0, %v2128_v1 }
 0x1e9   : > { %v777_v16 = vpop.permute.xlu0 %776 }
 0x1ea   : > { %v782_v17 = vsel %vm729_vm2, %v777_v16, 0 }
 0x1eb   : > { %1907 = vmatpush3.bf16.xpose.msra.mxu0 %v782_v17 }
 0x1ec   : > { %1918 = vmatprep.subr.bf16.mxu0 %v2128_v1 }
 0x1ed   : > { %v825_v18 = vpop.permute.xlu1 %824  ;;  %v873_v20 = vpop.permute.xlu0 %872 }
 0x1ee   : > { %v830_v19 = vsel %vm729_vm2, %v825_v18, 0  ;;  %v878_v21 = vsel %vm729_vm2, %v873_v20, 0 }
 0x1ef   : > { %1913 = vmatpush3.bf16.xpose.msra.mxu1 %v830_v19 }
 0x1f0   : > { %1924 = vmatprep.subr.bf16.mxu1 %v2128_v1 }
 0x1f2   : > { %1909 = vmatmul.mubr.msk.bf16.vlgmr.msra.gmra.mrb[4].mxu0 %vm729_vm2, %v2339_v12 }
 0x1f3   : > { %1919 = vmatpush3.bf16.xpose.msra.mxu0 %v878_v21  ;;  %1920 = vmatprep.mubr.msk.bf16.mxu0 %vm2129_vm0, %v2128_v1 }
 0x1f4   : > { %1930 = vmatprep.subr.bf16.mxu0 %v2128_v1 }
 0x1f6   : > { %1915 = vmatmul.mubr.msk.bf16.vlgmr.msra.gmra.mrb[4].mxu1 %vm729_vm2, %v2342_v14 }
 0x1f7   : > { %1926 = vmatprep.mubr.msk.bf16.mxu1 %vm2129_vm0, %v2128_v1 }
 0x1fa   : > { %1921 = vmatmul.mubr.msk.bf16.vlgmr.msra.gmra.mrb[8].mxu0 %vm729_vm2, %v2337_v11 }
 0x1fb   : > { %1932 = vmatprep.mubr.msk.bf16.mxu0 %vm2129_vm0, %v2128_v1 }
 0x256   : > { %v770_v25 = vpop.f32.mrb[0].mxu1 }
 0x257   : > { %v920_v26 = vmul.f32 0.35355338, %v770_v25  ;;  %v1904_v27 = vpop.f32.mrb[1].mxu1 }
 0x258   : > { %v773_v28 = vpop.f32.mrb[2].mxu1 }
 0x259   : > { %v1905_v29 = vpop.f32.mrb[3].mxu1  ;;  %v926_v30 = vsel %vm726_vm3, %v920_v26, -1e+30 }
 0x25a   : > { %v930_v31 = vsel %vm729_vm2, %v926_v30, -inf }
 0x25b   : > { %931 = vmax.xlane.f32.xlu1 %v930_v31 }
 0x2c5   : > { %v818_v32 = vpop.f32.mrb[4].mxu0 }
 0x2c6   : > { %v921_v33 = vmul.f32 0.35355338, %v818_v32  ;;  %v1910_v34 = vpop.f32.mrb[5].mxu0 }
 0x2c7   : > { %v821_v35 = vpop.f32.mrb[6].mxu0 }
 0x2c8   : > { %v1911_v36 = vpop.f32.mrb[7].mxu0  ;;  %v927_v37 = vsel %vm726_vm3, %v921_v33, -1e+30 }
 0x2c9   : > { %v866_v38 = vpop.f32.mrb[4].mxu1  ;;  %v933_v39 = vsel %vm729_vm2, %v927_v37, -inf }
 0x2ca   : > { %v922_v40 = vmul.f32 0.35355338, %v866_v38  ;;  %v1916_v41 = vpop.f32.mrb[5].mxu1  ;;  %934 = vmax.xlane.f32.xlu0 %v933_v39  ;;  %v2046_v39 = vld [vmem:[%s2515_s3] sm:$0xff]  }
 0x2cb   : > { %v869_v42 = vpop.f32.mrb[6].mxu1 }
 0x2cc   : > { %v1917_v43 = vpop.f32.mrb[7].mxu1  ;;  %v928_v44 = vsel %vm726_vm3, %v922_v40, -1e+30  ;;  %v2047_v40 = vld [vmem:[%s2515_s3 + $0x8] sm:$0xff]  }
 0x2cd   : > { %v914_v45 = vpop.f32.mrb[8].mxu0  ;;  %v936_v46 = vsel %vm729_vm2, %v928_v44, -inf }
 0x2ce   : > { %v923_v47 = vmul.f32 0.35355338, %v914_v45  ;;  %937 = vmax.xlane.f32.xlu0 %v936_v46  ;;  %v1922_v48 = vpop.f32.mrb[9].mxu0 }
 0x2cf   : > { %v917_v49 = vpop.f32.mrb[10].mxu0 }
 0x2d0   : > { %v1923_v50 = vpop.f32.mrb[11].mxu0  ;;  %v929_v51 = vsel %vm726_vm3, %v923_v47, -1e+30 }
 0x2d1   : > { %v939_v52 = vsel %vm729_vm2, %v929_v51, -inf }
 0x2d2   : > { %940 = vmax.xlane.f32.xlu1 %v939_v52 }
 0x2e3   : > { %1027 = vrot.lane.b32.xlu1 %v2339_v12, %s2134_s29 }
 0x2e4   : > { %978 = vrot.lane.b32.xlu0 %v2331_v9, %s2134_s29 }
 0x2e8   : > { %v932_v53 = vpop.xlane.xlu1 %931 }
 0x2e9   : > { %v942_v54 = vsub.f32 %v926_v30, %v932_v53 }
 0x2eb   : > { %v946_v55 = vmul.f32 1.442695, %v942_v54 }
 0x2ed   : > { %2050 = vpow2.f32 %v946_v55 }
 0x2f7   : > { %v2051_v56 = vpop.eup %2050 }
 0x2f8   : > { %v954_v57 = vsel %vm729_vm2, %v2051_v56, 0.0 }
 0x303   : > { %955 = vadd.xlane.f32.xlu0 %v954_v57 }
 0x357   : > { %v935_v58 = vpop.xlane.xlu0 %934 }
 0x358   : > { %v943_v59 = vsub.f32 %v927_v37, %v935_v58 }
 0x35a   : > { %v948_v60 = vmul.f32 1.442695, %v943_v59 }
 0x35b   : > { %v938_v61 = vpop.xlane.xlu0 %937 }
 0x35c   : > { %2052 = vpow2.f32 %v948_v60  ;;  %v944_v62 = vsub.f32 %v928_v44, %v938_v61  ;;  %v1824_v60 = vld [vmem:[%s2516_s4] ss:$0 sm:$0xff]  ;;  %v1255_v61 = vunpack.c.l.bf16 %v2321_v3 }
 0x35d   : > { %v2048_v3 = vld [vmem:[%s2550_s14] sm:$0xff]  }
 0x35e   : > { %v950_v63 = vmul.f32 1.442695, %v944_v62 }
 0x35f   : > { %v979_v0 = vpop.permute.xlu0 %978  ;;  %v941_v2 = vpop.xlane.xlu1 %940 }
 0x360   : > { %2054 = vpow2.f32 %v950_v63  ;;  %v985_v4 = vsel %vm983_vm4, %v979_v0, 0  ;;  %v945_v5 = vsub.f32 %v929_v51, %v941_v2 }
 0x361   : > { %1925 = vmatpush3.bf16.msra.mxu1 %v985_v4 }
 0x362   : > { %v952_v6 = vmul.f32 1.442695, %v945_v5  ;;  %1936 = vmatprep.subr.bf16.mxu1 %v2128_v1 }
 0x363   : > { %v1028_v7 = vpop.permute.xlu1 %1027 }
 0x364   : > { %2056 = vpow2.f32 %v952_v6  ;;  %v1033_v8 = vsel %vm983_vm4, %v1028_v7, 0 }
 0x365   : > { %1931 = vmatpush3.bf16.msra.mxu0 %v1033_v8 }
 0x366   : > { %v2053_v9 = vpop.eup %2052  ;;  %1942 = vmatprep.subr.bf16.mxu0 %v2128_v1 }
 0x367   : > { %v957_v10 = vsel %vm729_vm2, %v2053_v9, 0.0 }
 0x368   : > { %958 = vadd.xlane.f32.xlu1 %v957_v10 }
 0x36a   : > { %v2055_v12 = vpop.eup %2054 }
 0x36b   : > { %v960_v13 = vsel %vm729_vm2, %v2055_v12, 0.0 }
 0x36c   : > { %961 = vadd.xlane.f32.xlu0 %v960_v13  ;;  %v2049_v13 = vld [vmem:[%s2550_s14 + $0x8] sm:$0xff]  }
 0x36e   : > { %v2057_v15 = vpop.eup %2056 }
 0x36f   : > { %v963_v16 = vsel %vm729_vm2, %v2057_v15, 0.0 }
 0x370   : > { %964 = vadd.xlane.f32.xlu1 %v963_v16 }
 0x381   : > { %1075 = vrot.lane.b32.xlu1 %v2342_v14, %s2134_s29 }
 0x382   : > { %1123 = vrot.lane.b32.xlu0 %v2337_v11, %s2134_s29 }
 0x390   : > { %v956_v17 = vpop.xlane.xlu0 %955 }
 0x391   : > { %2058 = vrcp.f32 %v956_v17 }
 0x39b   : > { %v2059_v18 = vpop.eup %2058 }
 0x39c   : > { %v967_v19 = vmul.f32 %v2059_v18, %v2051_v56 }
 0x39e   : > { %v974_v20 = vpack.c.bf16 %v967_v19, %v967_v19 }
 0x3a0   : > { %1927 = vmatmul.mubr.msk.bf16.vlgmr.msra.gmra.mrb[8].mxu1 %vm729_vm2, %v974_v20 }
 0x3a1   : > { %1938 = vmatprep.mubr.msk.bf16.mxu1 %vm2129_vm0, %v2128_v1 }
 0x3f5   : > { %v959_v21 = vpop.xlane.xlu1 %958 }
 0x3f6   : > { %2060 = vrcp.f32 %v959_v21  ;;  %v1829_v21 = vld [vmem:[%s2552_s23] ss:$0 sm:$0xff] }
 0x3f9   : > { %v962_v22 = vpop.xlane.xlu0 %961 }
 0x3fa   : > { %2062 = vrcp.f32 %v962_v22 }
 0x3fd   : > { %v965_v23 = vpop.xlane.xlu1 %964  ;;  %v1124_v11 = vpop.permute.xlu0 %1123 }
 0x3fe   : > { %2064 = vrcp.f32 %v965_v23  ;;  %v1129_v30 = vsel %vm983_vm4, %v1124_v11, 0 }
 0x400   : > { %v2061_v14 = vpop.eup %2060 }
 0x401   : > { %v969_v24 = vmul.f32 %v2061_v14, %v2053_v9  ;;  %v1076_v25 = vpop.permute.xlu1 %1075 }
 0x402   : > { %v1081_v26 = vsel %vm983_vm4, %v1076_v25, 0 }
 0x403   : > { %1937 = vmatpush3.bf16.msra.mxu1 %v1081_v26  ;;  %v975_v27 = vpack.c.bf16 %v969_v24, %v969_v24  ;;  %v1830_v24 = vld [vmem:[%s2553_s5] ss:$0 sm:$0xff] }
 0x404   : > { %v2063_v28 = vpop.eup %2062  ;;  %1948 = vmatprep.subr.bf16.mxu1 %v2128_v1 }
 0x405   : > { %v971_v29 = vmul.f32 %v2063_v28, %v2055_v12  ;;  %1933 = vmatmul.mubr.msk.bf16.vlgmr.msra.gmra.mrb[12].mxu0 %vm729_vm2, %v975_v27 }
 0x406   : > { %1943 = vmatpush3.bf16.msra.mxu0 %v1129_v30  ;;  %1944 = vmatprep.mubr.msk.bf16.mxu0 %vm2129_vm0, %v2128_v1 }
 0x407   : > { %v976_v31 = vpack.c.bf16 %v971_v29, %v971_v29  ;;  %1956 = vmatprep.subr.bf16.mxu0 %v2128_v1 }
 0x408   : > { %v2065_v32 = vpop.eup %2064 }
 0x409   : > { %v973_v33 = vmul.f32 %v2065_v32, %v2057_v15  ;;  %1939 = vmatmul.mubr.msk.bf16.vlgmr.msra.gmra.mrb[12].mxu1 %vm729_vm2, %v976_v31 }
 0x40a   : > { %1952 = vmatprep.mubr.msk.bf16.mxu1 %vm2129_vm0, %v2128_v1  ;;  %1949 = vmatpush3.bf16.msra.mxu1 %v2046_v39 }
 0x40b   : > { %v977_v34 = vpack.c.bf16 %v973_v33, %v973_v33  ;;  %1950 = vmatprep.subr.bf16.mxu1 %v2128_v1 }
 0x40d   : > { %1945 = vmatmul.mubr.msk.bf16.vlgmr.msra.gmra.mrb[16].mxu0 %vm729_vm2, %v977_v34 }
 0x40e   : > { %1960 = vmatprep.mubr.msk.bf16.mxu0 %vm2129_vm0, %v2128_v1  ;;  %1951 = vmatpush3.bf16.msra.mxu1 %v2047_v40 }
 0x40f   : > { %1957 = vmatpush3.bf16.msra.mxu0 %v2048_v3 }
 0x410   : > { %1958 = vmatprep.subr.bf16.mxu0 %v2128_v1 }
 0x413   : > { %1959 = vmatpush3.bf16.msra.mxu0 %v2049_v13 }
 0x473   : > { %v1021_v35 = vpop.f32.mrb[8].mxu1 }
 0x474   : > { %v1928_v36 = vpop.f32.mrb[9].mxu1 }
 0x475   : > { %v1024_v37 = vpop.f32.mrb[10].mxu1 }
 0x476   : > { %v1929_v38 = vpop.f32.mrb[11].mxu1 }
 0x4d8   : > { %v1069_v41 = vpop.f32.mrb[12].mxu0 }
 0x4d9   : > { %1172 = vrot.lane.b32.xlu1 %v1069_v41, %s2135_s20  ;;  %v1934_v42 = vpop.f32.mrb[13].mxu0  ;;  %s2554_s20 = scalar_lea.vmem %s2528_s16, %s2569_s25 }
 0x4da   : > { %v1072_v43 = vpop.f32.mrb[14].mxu0 }
 0x4db   : > { %v1935_v44 = vpop.f32.mrb[15].mxu0 }
 0x4dc   : > { %v1117_v45 = vpop.f32.mrb[12].mxu1 }
 0x4dd   : > { %1176 = vrot.lane.b32.xlu0 %v1117_v45, %s2136_s1  ;;  %v1940_v46 = vpop.f32.mrb[13].mxu1  ;;  %s2551_s1 = sld [smem:[#allocation13_spill]] }
 0x4de   : > { %v1120_v47 = vpop.f32.mrb[14].mxu1 }
 0x4df   : > { %v1941_v48 = vpop.f32.mrb[15].mxu1 }
 0x4e0   : > { %v1165_v49 = vpop.f32.mrb[16].mxu0 }
 0x4e1   : > { %1180 = vrot.lane.b32.xlu1 %v1165_v49, %s2137_s0  ;;  %v1946_v50 = vpop.f32.mrb[17].mxu0 }
 0x4e2   : > { %v1168_v51 = vpop.f32.mrb[18].mxu0 }
 0x4e3   : > { %v1947_v52 = vpop.f32.mrb[19].mxu0  ;;  %v1828_v19 = vld [vmem:[%s2551_s1] ss:$0 sm:$0xff] }
 0x54b   : > { %v1173_v53 = vpop.permute.xlu1 %1172 }
 0x54c   : > { %v1183_v55 = vsel %vm729_vm2, %v1021_v35, %v1173_v53 }
 0x54f   : > { %v1177_v54 = vpop.permute.xlu0 %1176 }
 0x550   : > { %v1185_v56 = vsel %vm1184_vm5, %v1183_v55, %v1177_v54 }
 0x553   : > { %v1181_v57 = vpop.permute.xlu1 %1180 }
 0x554   : > { %v1187_v58 = vsel %vm1186_vm6, %v1185_v56, %v1181_v57 }
 0x555   : > { %v1188_v59 = vpack.c.bf16 %v1187_v58, %v1187_v58 }
 0x557   : > { %1953 = vmatmul.mubr.msk.bf16.vlgmr.msra.gmra.mrb[16].mxu1 %vm670_vm1, %v1188_v59 }
 0x62a   : > { %v1249_v62 = vpop.f32.mrb[16].mxu1 }
 0x62b   : > { %v1250_v63 = vadd.f32 %v1824_v60, %v1249_v62  ;;  %v1954_v0 = vpop.f32.mrb[17].mxu1 }
 0x62c   : > { %v1252_v2 = vpop.f32.mrb[18].mxu1 }
 0x62d   : > { %v1955_v4 = vpop.f32.mrb[19].mxu1  ;;  %v1256_v5 = vadd.f32 %v1255_v61, %v1250_v63 }
 0x62f   : > { %v1259_v6 = vsel %vm670_vm1, %v1256_v5, 0.0 }
 0x630   : > { %1260 = vadd.xlane.f32.xlu0 %v1259_v6 }
 0x6bd   : > { %v1261_v7 = vpop.xlane.xlu0 %1260 }
 0x6be   : > { %v1263_v8 = vmul.f32 0.03125, %v1261_v7 }
 0x6c0   : > { %v1264_v9 = vsub.f32 %v1256_v5, %v1263_v8 }
 0x6c2   : > { %v1265_v10 = vmul.f32 %v1264_v9, %v1264_v9 }
 0x6c4   : > { %v1266_v12 = vsel %vm670_vm1, %v1265_v10, 0.0 }
 0x6c5   : > { %1267 = vadd.xlane.f32.xlu1 %v1266_v12 }
 0x752   : > { %v1268_v15 = vpop.xlane.xlu1 %1267 }
 0x753   : > { %v1269_v16 = vmul.f32 0.03125, %v1268_v15 }
 0x755   : > { %v1270_v17 = vadd.f32 1e-05, %v1269_v16 }
 0x757   : > { %2066 = vrsqrt.f32 %v1270_v17 }
 0x761   : > { %v2067_v18 = vpop.eup %2066 }
 0x762   : > { %v1272_v20 = vmul.f32 %v2067_v18, %v1264_v9 }
 0x764   : > { %v1279_v22 = vmul.f32 %v1828_v19, %v1272_v20 }
 0x766   : > { %v1286_v23 = vadd.f32 %v1829_v21, %v1279_v22 }
 0x768   : > { %v1287_v14 = vpack.c.bf16 %v1286_v23, %v1286_v23  ;;  %1288 = vst.msk [vmem:[#allocation2] sm:$0xff] %vm670_vm1, %v1286_v23 }
 0x76a   : > { %1290 = vst.msk [vmem:[#allocation3] sm:$0xf] %vm1289_vm7, %v1287_v14  ;;  %1961 = vmatmul.mubr.msk.bf16.vlgmr.msra.gmra.mrb[20].mxu0 %vm670_vm1, %v1287_v14 }
 0x83d   : > { %v1351_v25 = vpop.f32.mrb[20].mxu0 }
 0x83e   : > { %v1352_v11 = vadd.f32 %v1830_v24, %v1351_v25  ;;  %v1962_v26 = vpop.f32.mrb[21].mxu0 }
 0x83f   : > { %v1354_v27 = vpop.f32.mrb[22].mxu0 }
 0x840   : > { %v1963_v28 = vpop.f32.mrb[23].mxu0  ;;  %v1358_v29 = vsel %vm1357_vm8, %v1352_v11, -inf }
 0x841   : > { %1359 = vmax.xlane.f32.xlu0 %v1358_v29 }
 0x8ce   : > { %v1360_v30 = vpop.xlane.xlu0 %1359 }
 0x8cf   : > { %vm1361_vm9 = vcmp.ge.f32.partialorder %v1352_v11, %v1360_v30  ;;  %v1380_v31 = vsub.f32 %v1352_v11, %v1360_v30 }
 0x8d0   : > { %v1362_v32 = vsel %vm1361_vm9, -1e+30, %v1352_v11 }
 0x8d1   : > { %v1381_v33 = vmul.f32 1.442695, %v1380_v31  ;;  %v1363_v34 = vsel %vm1357_vm8, %v1362_v32, -inf }
 0x8d2   : > { %1364 = vmax.xlane.f32.xlu0 %v1363_v34 }
 0x8d3   : > { %2068 = vpow2.f32 %v1381_v33 }
 0x8dd   : > { %v2069_v35 = vpop.eup %2068 }
 0x8de   : > { %v1383_v36 = vsel %vm1357_vm8, %v2069_v35, 0.0 }
 0x8df   : > { %1384 = vadd.xlane.f32.xlu0 %v1383_v36 }
 0x95f   : > { %v1365_v37 = vpop.xlane.xlu0 %1364 }
 0x960   : > { %vm1366_vm10 = vcmp.ge.f32.partialorder %v1352_v11, %v1365_v37 }
 0x961   : > { %v1834_v38 = vsel %vm1366_vm10, 1.0, %v2128_v1  ;;  %v1367_v39 = vsel %vm1366_vm10, %v1352_v11, -1e+30 }
 0x962   : > { %v1390_v40 = vsel %vm1357_vm8, %v1834_v38, 0.0  ;;  %v1368_v41 = vsel %vm1357_vm8, %v1367_v39, -inf }
 0x963   : > { %v1391_v42 = vrot.slane %v1390_v40, 4  ;;  %1369 = vmax.xlane.f32.xlu1 %v1368_v41 }
 0x965   : > { %v1392_v43 = vadd.f32 %v1391_v42, %v1390_v40 }
 0x967   : > { %v1393_v44 = vrot.slane %v1392_v43, 2 }
 0x969   : > { %v1394_v45 = vadd.f32 %v1393_v44, %v1392_v43 }
 0x96b   : > { %v1395_v46 = vrot.slane %v1394_v45, 1 }
 0x96c   : > { %v1385_v47 = vpop.xlane.xlu0 %1384 }
 0x96d   : > { %v1396_v48 = vadd.f32 %v1395_v46, %v1394_v45  ;;  %2070 = vrcp.f32 %v1385_v47 }
 0x96f   : > { %v1404_v49 = vsel %vm1357_vm8, %v1396_v48, 0.0 }
 0x970   : > { %1406 = vst [vmem:[%s2554_s20] sm:$0x1] %v1404_v49 }
 0x977   : > { %v2071_v1 = vpop.eup %2070 }
 0x978   : > { %v1387_v50 = vmul.f32 %v2071_v1, %v2069_v35 }
 0x97a   : > { %v1397_v51 = vsel %vm1357_vm8, %v1387_v50, 0.0 }
 0x97b   : > { %v1398_v52 = vrot.slane %v1397_v51, 4 }
 0x97d   : > { %v1399_v53 = vadd.f32 %v1398_v52, %v1397_v51 }
 0x97f   : > { %v1400_v54 = vrot.slane %v1399_v53, 2 }
 0x981   : > { %v1401_v55 = vadd.f32 %v1400_v54, %v1399_v53 }
 0x983   : > { %v1402_v56 = vrot.slane %v1401_v55, 1 }
 0x985   : > { %v1403_v57 = vadd.f32 %v1402_v56, %v1401_v55 }
 0x987   : > { %v1405_v58 = vsel %vm1357_vm8, %v1403_v57, 0.0 }
 0x988   : > { %1407 = vst [vmem:[%s640_s13] sm:$0x1] %v1405_v58 }
 0x9f0   : > { %v1370_v59 = vpop.xlane.xlu1 %1369 }
 0x9f1   : > { %v1371_v60 = vsub.f32 %v1367_v39, %v1370_v59 }
 0x9f3   : > { %v1372_v61 = vmul.f32 1.442695, %v1371_v60 }
 0x9f5   : > { %2072 = vpow2.f32 %v1372_v61 }
 0x9ff   : > { %v2073_v62 = vpop.eup %2072 }
 0xa00   : > { %v1374_v63 = vsel %vm1357_vm8, %v2073_v62, 0.0 }
 0xa01   : > { %1375 = vadd.xlane.f32.xlu1 %v1374_v63 }
 0xa8e   : > { %v1376_v0 = vpop.xlane.xlu1 %1375 }
 0xa8f   : > { %2074 = vrcp.f32 %v1376_v0 }
 0xa99   : > { %v2075_v2 = vpop.eup %2074 }
 0xa9a   : > { %v1378_v4 = vmul.f32 %v2075_v2, %v2073_v62 }
 0xa9c   : > { %1379 = vst.msk [vmem:[#allocation4] sm:$0xff] %vm1357_vm8, %v1378_v4 }
 0xa9d PF: > { %v2076_v5 = vld [vmem:[%s2280_s28] sm:$0xff]   ;;  %v2138_v6 = vmov 0.0   ;;  %v2077_v7 = vld [vmem:[%s2280_s28 + $0x8] sm:$0xff]   ;;  %vm2139_vm11 = vmmov 0   ;;  %vm1433_vm12 = vcmask 261120   ;;  %v2080_v12 = vld [vmem:[%s2294_s21 + $0x10] sm:$0xff]   ;;  %v1590_v18 = vlaneseq }
 0xa9e   : > { %1964 = vmatprep.subr.bf16.mxu0 %v2138_v6  ;;  %1972 = vmatprep.subr.bf16.mxu1 %v2138_v6  ;;  %v2078_v8 = vld [vmem:[%s2294_s21] sm:$0xff]   ;;  %v2079_v9 = vld [vmem:[%s2294_s21 + $0x8] sm:$0xff]   ;;  %v2081_v3 = vld [vmem:[%s2294_s21 + $0x18] sm:$0xff]   ;;  %v1592_v19 = vstv %s2110_s24  ;;  %vm1596_vm13 = vcmask 31744   ;;  %p1848_p8 = scmp.ne.s32.totalorder %s2110_s24, 3 }
 0xa9f   : > { %1965 = vmatpush3.bf16.msra.mxu0 %v2076_v5  ;;  %1968 = vmatprep.mubr.msk.bf16.mxu0 %vm2139_vm11, %v2138_v6  ;;  %v1409_v10 = vld [vmem:[#allocation3] sm:$0xf]  ;;  %v2082_v13 = vld [vmem:[%s2294_s21 + $0x20] sm:$0xff]   ;;  %v2084_v16 = vld [vmem:[%s2294_s21 + $0x30] sm:$0xff]   ;;  %v1591_v20 = vand.u32 127, %v1590_v18  ;;  %s2555_s30 = sld [smem:[#allocation17_spill]] (!%p1848_p8) }
 0xaa0   : > { %1966 = vmatprep.subr.bf16.mxu0 %v2138_v6  ;;  %1988 = vmatprep.mubr.msk.bf16.mxu1 %vm2139_vm11, %v2138_v6  ;;  %v2083_v15 = vld [vmem:[%s2294_s21 + $0x28] sm:$0xff]   ;;  %v2085_v17 = vld [vmem:[%s2294_s21 + $0x38] sm:$0xff]   ;;  %v1835_v14 = vld [vmem:[%s622_s8] ss:$0 sm:$0xff]  ;;  %s2556_s23 = sld [smem:[#allocation18_spill]] (!%p1848_p8)  ;;  %vm1642_vm15 = vcmask (!%p1848_p8), 257024  }
 0xaa1   : > { %1973 = vmatpush3.bf16.msra.mxu1 %v2078_v8  ;;  %vm1593_vm14 = vcmp.eq.s32.totalorder %v1591_v20, %v1592_v19  ;;  %v1839_v30 = vld [vmem:[%s630_s19] ss:$0 sm:$0xff]  ;;  %v1600_v36 = vld [vmem:[#allocation5] sm:$0xff] }
 0xaa2   : > { %1974 = vmatprep.subr.bf16.mxu1 %v2138_v6  ;;  %v1608_v40 = vld [vmem:[#allocation2] sm:$0xff] (!%p1848_p8) }
 0xaa3   : > { %1967 = vmatpush3.bf16.msra.mxu0 %v2077_v7  ;;  %v1594_v21 = vld [vmem:[#allocation4] sm:$0xff] }
 0xaa4   : > { %v1595_v22 = vsel %vm1593_vm14, %v1594_v21, 0.0 }
 0xaa5   : > { %1975 = vmatpush3.bf16.msra.mxu1 %v2079_v9  ;;  %v1597_v23 = vsel %vm1596_vm13, %v1595_v22, 0.0  ;;  %v1849_v52 = vld [vmem:[%s2555_s30] ss:$0 sm:$0xff] (!%p1848_p8) }
 0xaa6   : > { %1969 = vmatmul.mubr.msk.bf16.vlgmr.msra.gmra.mrb[0].mxu0 %vm1433_vm12, %v1409_v10  ;;  %1976 = vmatprep.subr.bf16.mxu1 %v2138_v6  ;;  %v1850_v54 = vld [vmem:[%s2556_s23] ss:$0 sm:$0xff] (!%p1848_p8) }
 0xaa7   : > { %1598 = vadd.xlane.f32.xlu0 %v1597_v23 }
 0xaa9   : > { %1977 = vmatpush3.bf16.msra.mxu1 %v2080_v12 }
 0xaaa   : > { %1978 = vmatprep.subr.bf16.mxu1 %v2138_v6 }
 0xaad   : > { %1979 = vmatpush3.bf16.msra.mxu1 %v2081_v3 }
 0xaae   : > { %1980 = vmatprep.subr.bf16.mxu1 %v2138_v6 }
 0xab1   : > { %1981 = vmatpush3.bf16.msra.mxu1 %v2082_v13 }
 0xab2   : > { %1982 = vmatprep.subr.bf16.mxu1 %v2138_v6 }
 0xab5   : > { %1983 = vmatpush3.bf16.msra.mxu1 %v2083_v15 }
 0xab6   : > { %1984 = vmatprep.subr.bf16.mxu1 %v2138_v6 }
 0xab9   : > { %1985 = vmatpush3.bf16.msra.mxu1 %v2084_v16 }
 0xaba   : > { %1986 = vmatprep.subr.bf16.mxu1 %v2138_v6 }
 0xabd   : > { %1987 = vmatpush3.bf16.msra.mxu1 %v2085_v17 }
 0xb34   : > { %v1599_v32 = vpop.xlane.xlu0 %1598 }
 0xb79   : > { %v1471_v24 = vpop.f32.mrb[0].mxu0 }
 0xb7a   : > { %v1472_v25 = vadd.f32 %v1835_v14, %v1471_v24  ;;  %v1970_v11 = vpop.f32.mrb[1].mxu0 }
 0xb7b   : > { %v1474_v26 = vpop.f32.mrb[2].mxu0 }
 0xb7c   : > { %v1477_v27 = vmax.f32 %v1472_v25, 0.0  ;;  %v1971_v28 = vpop.f32.mrb[3].mxu0 }
 0xb7e   : > { %v1478_v29 = vpack.c.bf16 %v1477_v27, %v1477_v27 }
 0xb80   : > { %1989 = vmatmul.mubr.bf16.vlgmr.msra.gmra.mrb[0].mxu1 %v1478_v29 }
 0xc53   : > { %v1584_v31 = vpop.f32.mrb[0].mxu1 }
 0xc54   : > { %v1585_v33 = vadd.f32 %v1839_v30, %v1584_v31  ;;  %v1990_v34 = vpop.f32.mrb[1].mxu1  ;;  %1607 = sbr.rel (%p1848_p8) target bundleno = 3488 (0xda0), region = 88 }
 0xc55   : > { %v1587_v35 = vpop.f32.mrb[2].mxu1 }
 0xc56   : > { %v1601_v37 = vmul.f32 %v1599_v32, %v1585_v33  ;;  %v1991_v38 = vpop.f32.mrb[3].mxu1 }
 0xc58   : > { %v1602_v39 = vadd.f32 %v1601_v37, %v1600_v36 }
 0xc5a   : > { %1603 = vst.msk [vmem:[#allocation5] sm:$0xff] %vm1433_vm12, %v1602_v39 }
 0xc61   : > { %v1609_v41 = vld [vmem:[#allocation5] sm:$0xff] }
 0xc62   : > { %v1610_v42 = vadd.f32 %v1609_v41, %v1608_v40 }
 0xc64   : > { %v1613_v43 = vsel %vm1433_vm12, %v1610_v42, 0.0 }
 0xc65   : > { %1614 = vadd.xlane.f32.xlu0 %v1613_v43 }
 0xcf2   : > { %v1615_v44 = vpop.xlane.xlu0 %1614 }
 0xcf3   : > { %v1617_v45 = vmul.f32 0.03125, %v1615_v44 }
 0xcf5   : > { %v1618_v46 = vsub.f32 %v1610_v42, %v1617_v45 }
 0xcf7   : > { %v1619_v47 = vmul.f32 %v1618_v46, %v1618_v46 }
 0xcf9   : > { %v1620_v48 = vsel %vm1433_vm12, %v1619_v47, 0.0 }
 0xcfa   : > { %1621 = vadd.xlane.f32.xlu0 %v1620_v48 }
 0xd87   : > { %v1622_v49 = vpop.xlane.xlu0 %1621 }
 0xd88   : > { %v1623_v1 = vmul.f32 0.03125, %v1622_v49 }
 0xd8a   : > { %v1624_v50 = vadd.f32 1e-05, %v1623_v1 }
 0xd8c   : > { %2086 = vrsqrt.f32 %v1624_v50 }
 0xd96   : > { %v2087_v51 = vpop.eup %2086 }
 0xd97   : > { %v1626_v53 = vmul.f32 %v2087_v51, %v1618_v46 }
 0xd99   : > { %v1633_v55 = vmul.f32 %v1849_v52, %v1626_v53 }
 0xd9b   : > { %v1640_v56 = vadd.f32 %v1850_v54, %v1633_v55 }
 0xd9d   : > { %v1641_v57 = vpack.c.bf16 %v1640_v56, %v1640_v56 }
 0xd9f   : > { %1643 = vst.msk [vmem:[%s2299_s26] sm:$0xf] %vm1642_vm15, %v1641_v57 }
 0xda0 PF: > { %s2557_s27 = sld [smem:[#allocation8_spill]]  ;;  %s2558_s24 = sld [smem:[#allocation6_spill]] }
 0xda1   : > { %s2559_s25 = sld [smem:[#allocation7_spill]]  ;;  %s2560_s26 = sld [smem:[#allocation9_spill]] }
 0xda6   : > { %s28_s28 = sadd.s32 1, %s2557_s27   ;;  %s2561_s27 = sld [smem:[#allocation10_spill]] }
 0xda7   : > { %p25_p9 = scmp.ge.s32.totalorder %s28_s28, 10  }
 0xda9   :  { %27 = sbr.rel (!%p25_p9) target bundleno = 9 (0x9), region = 154 }

</bundles_post_ra>
